<compile_context>
chip_gen: v7x
topology: tpu7x:2x2x1
jax: 0.10.0
libtpu: 0.0.40
codegen_flags: <defaults>
</compile_context>

<pallas_src>
import functools

import jax
import jax.numpy as jnp
from jax.experimental import pallas as pl
from jax.experimental.pallas import tpu as pltpu

BN_EPS = 1e-5
NUM_LAYERS = 5


# --------------------------------------------------------------------------
# Fused kernel: adjacency build + 5 x (GIN + MLP + ReLU + folded-BN) + FC+ReLU
# --------------------------------------------------------------------------
def fused_gin_kernel(src_ref, dst_ref, x_ref,
                     w1_first_ref, w1_rest_ref, w2_ref, vec_ref,
                     fc_w_ref, fc_b_ref, o_ref):
    """Ref shapes:
         src_ref      (E, 1)   int32   edge_index[0] (source nodes)
         dst_ref      (1, E)   int32   edge_index[1] (target nodes)
         x_ref        (N, Fin) f32     node features
         w1_first_ref (Fin, d) bf16    layer-1 first Linear
         w1_rest_ref  (4, d, d) bf16   layers 2..5 first Linear
         w2_ref       (5, d, d) bf16   all layers second Linear
         vec_ref      (5, 4, d) f32    per layer [b1; b2; bn_scale; bn_shift]
         fc_w_ref     (d, out) bf16
         fc_b_ref     (1, out) f32
         o_ref        (N, out) f32     output
    """
    n = x_ref.shape[0]
    e = dst_ref.shape[1]

    # ---- A_hat = A + I, built on the MXU from one-hot edge encodings ------
    # A[i, j] = number of edges j -> i  (PyG source_to_target flow).
    row_iota = jax.lax.broadcasted_iota(jnp.int32, (n, e), 0)          # node i
    dst_oh = jnp.where(dst_ref[...] == row_iota, 1.0, 0.0).astype(jnp.bfloat16)
    col_iota = jax.lax.broadcasted_iota(jnp.int32, (e, n), 1)          # node j
    src_oh = jnp.where(src_ref[...] == col_iota, 1.0, 0.0).astype(jnp.bfloat16)
    a = jnp.dot(dst_oh, src_oh, preferred_element_type=jnp.float32)    # counts
    eye = jnp.where(
        jax.lax.broadcasted_iota(jnp.int32, (n, n), 0)
        == jax.lax.broadcasted_iota(jnp.int32, (n, n), 1), 1.0, 0.0)
    # Small integer counts -> exact in bf16; adjacency reused for 5 layers.
    a_hat = (a + eye).astype(jnp.bfloat16)

    h = x_ref[...]                                   # f32, stays in VMEM
    for li in range(NUM_LAYERS):
        w1 = w1_first_ref[...] if li == 0 else w1_rest_ref[li - 1]
        w2 = w2_ref[li]
        v = vec_ref[li]                              # (4, d)
        b1, b2 = v[0:1, :], v[1:2, :]
        scale, shift = v[2:3, :], v[3:4, :]

        # GIN aggregation with eps = 0:  (A + I) @ h   (bf16 MXU, f32 acc)
        agg = jnp.dot(a_hat, h.astype(jnp.bfloat16),
                      preferred_element_type=jnp.float32)

        # MLP: Linear -> ReLU -> Linear
        z = jnp.dot(agg.astype(jnp.bfloat16), w1,
                    preferred_element_type=jnp.float32) + b1
        z = jnp.maximum(z, 0.0)
        z = jnp.dot(z.astype(jnp.bfloat16), w2,
                    preferred_element_type=jnp.float32) + b2

        # F.relu(conv(...)) then folded BatchNorm1d (eval mode)
        z = jnp.maximum(z, 0.0)
        h = z * scale + shift

    # Final Linear(d -> output_dim) + ReLU; output is lane-dense (N, 1024).
    out = jnp.dot(h.astype(jnp.bfloat16), fc_w_ref[...],
                  preferred_element_type=jnp.float32) + fc_b_ref[...]
    o_ref[...] = jnp.maximum(out, 0.0)
    # TODO(synk): F.dropout(p=0.2) is identity in eval mode; training-mode
    # dropout would use pltpu.prng_seed / pltpu.prng_random_bits here.


# --------------------------------------------------------------------------
# pallas_call wrapper (single fused call, whole arrays as one VMEM block)
# --------------------------------------------------------------------------
def _full_spec(shape):
    return pl.BlockSpec(shape, lambda: (0,) * len(shape))


def fused_forward(src_e, dst_e, x, w1_first, w1_rest, w2_all, vec_all,
                  fc_w, fc_b):
    args = (src_e, dst_e, x, w1_first, w1_rest, w2_all, vec_all, fc_w, fc_b)
    n = x.shape[0]
    out_dim = fc_w.shape[1]
    return pl.pallas_call(
        fused_gin_kernel,
        out_shape=jax.ShapeDtypeStruct((n, out_dim), jnp.float32),
        in_specs=[_full_spec(a.shape) for a in args],
        out_specs=_full_spec((n, out_dim)),
        compiler_params=pltpu.CompilerParams(vmem_limit_bytes=32 * 1024 * 1024),
    )(*args)


# --------------------------------------------------------------------------
# Parameter construction (deterministic, synthetic) + graph glue
# --------------------------------------------------------------------------
def make_params(key, num_features_node=128, dim=32, output_dim=1024):
    def linear(k, fin, fout):
        kw, kb = jax.random.split(k)
        scale = 1.0 / jnp.sqrt(fin)
        w = jax.random.uniform(kw, (fin, fout), jnp.float32, -scale, scale)
        b = jax.random.uniform(kb, (1, fout), jnp.float32, -scale, scale)
        return w, b

    params = {"gin": [], "fc": None}
    in_dims = [num_features_node, dim, dim, dim, dim]
    keys = jax.random.split(key, 6)
    for li in range(NUM_LAYERS):
        k1, k2, kg, kb = jax.random.split(keys[li], 4)
        w1, b1 = linear(k1, in_dims[li], dim)
        w2, b2 = linear(k2, dim, dim)
        layer = {
            "w1": w1, "b1": b1, "w2": w2, "b2": b2,
            # BatchNorm1d parameters / running stats (eval mode)
            "gamma": 1.0 + 0.1 * jax.random.normal(kg, (1, dim), jnp.float32),
            "beta": 0.1 * jax.random.normal(kb, (1, dim), jnp.float32),
            "mean": jnp.zeros((1, dim), jnp.float32),
            "var": jnp.ones((1, dim), jnp.float32),
        }
        params["gin"].append(layer)
    wf, bf = linear(keys[5], dim, output_dim)
    params["fc"] = {"w": wf, "b": bf}
    return params


def edge_index_to_dense_adj(edge_index, num_nodes):
    """A[i, j] = number of edges j -> i (PyG source_to_target flow)."""
    src = edge_index[0]
    dst = edge_index[1]
    adj = jnp.zeros((num_nodes, num_nodes), jnp.float32)
    return adj.at[dst, src].add(1.0)


def _fold_bn(layer):
    scale = layer["gamma"] * jax.lax.rsqrt(layer["var"] + BN_EPS)
    shift = layer["beta"] - layer["mean"] * scale
    return scale, shift


# --------------------------------------------------------------------------
# Full forward pass
# --------------------------------------------------------------------------
@functools.partial(jax.jit, static_argnames=("num_nodes",))
def node_gin_conv_net(edge_index, node, params, *, num_nodes):
    # num_nodes no longer needed for an XLA-side adjacency build: the
    # adjacency is constructed inside the kernel from edge_index.
    del num_nodes
    e = edge_index.shape[1]
    src_e = edge_index[0].astype(jnp.int32).reshape(e, 1)
    dst_e = edge_index[1].astype(jnp.int32).reshape(1, e)

    layers = params["gin"]
    w1_first = layers[0]["w1"].astype(jnp.bfloat16)
    w1_rest = jnp.stack([l["w1"] for l in layers[1:]]).astype(jnp.bfloat16)
    w2_all = jnp.stack([l["w2"] for l in layers]).astype(jnp.bfloat16)

    vec_rows = []
    for l in layers:
        scale, shift = _fold_bn(l)
        vec_rows.append(jnp.concatenate([l["b1"], l["b2"], scale, shift],
                                        axis=0))            # (4, dim)
    vec_all = jnp.stack(vec_rows)                            # (5, 4, dim)

    fc_w = params["fc"]["w"].astype(jnp.bfloat16)
    fc_b = params["fc"]["b"]

    return fused_forward(src_e, dst_e, node, w1_first, w1_rest, w2_all,
                         vec_all, fc_w, fc_b)


# Pure-JAX reference mirroring the same bf16-operand / f32-accumulate math.
def reference_forward(edge_index, node, params, num_nodes):
    adj = edge_index_to_dense_adj(edge_index, num_nodes)
    a_hat = (adj + jnp.eye(num_nodes, dtype=jnp.float32)).astype(jnp.bfloat16)
    h = node
    for layer in params["gin"]:
        scale, shift = _fold_bn(layer)
        agg = jnp.dot(a_hat, h.astype(jnp.bfloat16),
                      preferred_element_type=jnp.float32)
        z = jnp.dot(agg.astype(jnp.bfloat16), layer["w1"].astype(jnp.bfloat16),
                    preferred_element_type=jnp.float32) + layer["b1"]
        z = jnp.maximum(z, 0.0)
        z = jnp.dot(z.astype(jnp.bfloat16), layer["w2"].astype(jnp.bfloat16),
                    preferred_element_type=jnp.float32) + layer["b2"]
        z = jnp.maximum(z, 0.0)
        h = z * scale + shift
    out = jnp.dot(h.astype(jnp.bfloat16), params["fc"]["w"].astype(jnp.bfloat16),
                  preferred_element_type=jnp.float32) + params["fc"]["b"]
    return jnp.maximum(out, 0.0)


# --------------------------------------------------------------------------
# Demo
# --------------------------------------------------------------------------
if __name__ == "__main__":
    key = jax.random.PRNGKey(0)
    k_params, k_feat, k_edge = jax.random.split(key, 3)

    NUM_NODES = 64
    NUM_EDGES = 256
    NUM_FEATURES = 128
    DIM = 32
    OUTPUT_DIM = 1024

    params = make_params(k_params, NUM_FEATURES, DIM, OUTPUT_DIM)

    node = jax.random.normal(k_feat, (NUM_NODES, NUM_FEATURES), jnp.float32)
    edge_index = jax.random.randint(k_edge, (2, NUM_EDGES), 0, NUM_NODES,
                                    dtype=jnp.int32)

    out = node_gin_conv_net(edge_index, node, params, num_nodes=NUM_NODES)
    out = jax.block_until_ready(out)

    assert out.shape == (NUM_NODES, OUTPUT_DIM)
    assert out.dtype == jnp.float32
    assert bool(jnp.all(jnp.isfinite(out)))

    ref = jax.block_until_ready(
        reference_forward(edge_index, node, params, NUM_NODES))
    assert bool(jnp.allclose(out, ref, atol=2e-2, rtol=2e-2))

    print("KERNEL_OK")
</pallas_src>

<mosaic_0001>
module attributes {stable_mosaic.version = 11 : i64} {
  func.func @fused_gin_kernel(%arg0: memref<256x1xi32, #tpu.memory_space<vmem>>, %arg1: memref<1x256xi32, #tpu.memory_space<vmem>>, %arg2: memref<64x128xf32, #tpu.memory_space<vmem>>, %arg3: memref<128x32xbf16, #tpu.memory_space<vmem>>, %arg4: memref<4x32x32xbf16, #tpu.memory_space<vmem>>, %arg5: memref<5x32x32xbf16, #tpu.memory_space<vmem>>, %arg6: memref<5x4x32xf32, #tpu.memory_space<vmem>>, %arg7: memref<32x1024xbf16, #tpu.memory_space<vmem>>, %arg8: memref<1x1024xf32, #tpu.memory_space<vmem>>, %arg9: memref<64x1024xf32, #tpu.memory_space<vmem>>) attributes {dimension_semantics = [], scalar_prefetch = 0 : i64, scratch_operands = 0 : i64, tpu.core_type = #tpu.core_type<tc>} {
    %0 = tpu.iota {dimensions = array<i32: 0>} : vector<64x256xi32>
    %c0 = arith.constant 0 : index
    %c0_0 = arith.constant 0 : index
    %1 = vector.load %arg1[%c0, %c0_0] : memref<1x256xi32, #tpu.memory_space<vmem>>, vector<1x256xi32>
    %2 = vector.broadcast %1 : vector<1x256xi32> to vector<64x256xi32>
    %3 = arith.cmpi eq, %2, %0 : vector<64x256xi32>
    %cst = arith.constant 1.000000e+00 : f32
    %cst_1 = arith.constant 0.000000e+00 : f32
    %4 = vector.broadcast %cst : f32 to vector<64x256xf32>
    %5 = vector.broadcast %cst_1 : f32 to vector<64x256xf32>
    %6 = arith.select %3, %4, %5 : vector<64x256xi1>, vector<64x256xf32>
    %7 = arith.truncf %6 : vector<64x256xf32> to vector<64x256xbf16>
    %8 = tpu.iota {dimensions = array<i32: 1>} : vector<256x64xi32>
    %c0_2 = arith.constant 0 : index
    %c0_3 = arith.constant 0 : index
    %9 = vector.load %arg0[%c0_2, %c0_3] : memref<256x1xi32, #tpu.memory_space<vmem>>, vector<256x1xi32>
    %10 = vector.broadcast %9 : vector<256x1xi32> to vector<256x64xi32>
    %11 = arith.cmpi eq, %10, %8 : vector<256x64xi32>
    %cst_4 = arith.constant 1.000000e+00 : f32
    %cst_5 = arith.constant 0.000000e+00 : f32
    %12 = vector.broadcast %cst_4 : f32 to vector<256x64xf32>
    %13 = vector.broadcast %cst_5 : f32 to vector<256x64xf32>
    %14 = arith.select %11, %12, %13 : vector<256x64xi1>, vector<256x64xf32>
    %15 = arith.truncf %14 : vector<256x64xf32> to vector<256x64xbf16>
    %cst_6 = arith.constant dense<0.000000e+00> : vector<64x64xf32>
    %16 = tpu.matmul %7, %15, %cst_6 {dimension_numbers = #tpu.dot_dimension_numbers<[1], [0], [0], [1], [0, 0, 1, 1], [], []>} : vector<64x256xbf16>, vector<256x64xbf16>, vector<64x64xf32> -> vector<64x64xf32>
    %17 = tpu.iota {dimensions = array<i32: 0>} : vector<64x64xi32>
    %18 = tpu.iota {dimensions = array<i32: 1>} : vector<64x64xi32>
    %19 = arith.cmpi eq, %17, %18 : vector<64x64xi32>
    %cst_7 = arith.constant 1.000000e+00 : f32
    %cst_8 = arith.constant 0.000000e+00 : f32
    %20 = vector.broadcast %cst_7 : f32 to vector<64x64xf32>
    %21 = vector.broadcast %cst_8 : f32 to vector<64x64xf32>
    %22 = arith.select %19, %20, %21 : vector<64x64xi1>, vector<64x64xf32>
    %23 = arith.addf %16, %22 : vector<64x64xf32>
    %24 = arith.truncf %23 : vector<64x64xf32> to vector<64x64xbf16>
    %c0_9 = arith.constant 0 : index
    %c0_10 = arith.constant 0 : index
    %25 = vector.load %arg2[%c0_9, %c0_10] : memref<64x128xf32, #tpu.memory_space<vmem>>, vector<64x128xf32>
    %c0_11 = arith.constant 0 : index
    %c0_12 = arith.constant 0 : index
    %26 = vector.load %arg3[%c0_11, %c0_12] : memref<128x32xbf16, #tpu.memory_space<vmem>>, vector<128x32xbf16>
    %c0_13 = arith.constant 0 : index
    %c0_14 = arith.constant 0 : index
    %c0_15 = arith.constant 0 : index
    %27 = vector.load %arg5[%c0_13, %c0_14, %c0_15] : memref<5x32x32xbf16, #tpu.memory_space<vmem>>, vector<1x32x32xbf16>
    %28 = vector.shape_cast %27 : vector<1x32x32xbf16> to vector<32x32xbf16>
    %c0_16 = arith.constant 0 : index
    %c0_17 = arith.constant 0 : index
    %c0_18 = arith.constant 0 : index
    %29 = vector.load %arg6[%c0_16, %c0_17, %c0_18] : memref<5x4x32xf32, #tpu.memory_space<vmem>>, vector<1x4x32xf32>
    %30 = vector.shape_cast %29 : vector<1x4x32xf32> to vector<4x32xf32>
    %31 = vector.extract_strided_slice %30 {offsets = [0, 0], sizes = [1, 32], strides = [1, 1]} : vector<4x32xf32> to vector<1x32xf32>
    %32 = vector.extract_strided_slice %30 {offsets = [1, 0], sizes = [1, 32], strides = [1, 1]} : vector<4x32xf32> to vector<1x32xf32>
    %33 = vector.extract_strided_slice %30 {offsets = [2, 0], sizes = [1, 32], strides = [1, 1]} : vector<4x32xf32> to vector<1x32xf32>
    %34 = vector.extract_strided_slice %30 {offsets = [3, 0], sizes = [1, 32], strides = [1, 1]} : vector<4x32xf32> to vector<1x32xf32>
    %35 = arith.truncf %25 : vector<64x128xf32> to vector<64x128xbf16>
    %cst_19 = arith.constant dense<0.000000e+00> : vector<64x128xf32>
    %36 = tpu.matmul %24, %35, %cst_19 {dimension_numbers = #tpu.dot_dimension_numbers<[1], [0], [0], [1], [0, 0, 1, 1], [], []>} : vector<64x64xbf16>, vector<64x128xbf16>, vector<64x128xf32> -> vector<64x128xf32>
    %37 = arith.truncf %36 : vector<64x128xf32> to vector<64x128xbf16>
    %cst_20 = arith.constant dense<0.000000e+00> : vector<64x32xf32>
    %38 = tpu.matmul %37, %26, %cst_20 {dimension_numbers = #tpu.dot_dimension_numbers<[1], [0], [0], [1], [0, 0, 1, 1], [], []>} : vector<64x128xbf16>, vector<128x32xbf16>, vector<64x32xf32> -> vector<64x32xf32>
    %39 = vector.broadcast %31 : vector<1x32xf32> to vector<64x32xf32>
    %40 = arith.addf %38, %39 : vector<64x32xf32>
    %cst_21 = arith.constant 0.000000e+00 : f32
    %41 = vector.broadcast %cst_21 : f32 to vector<64x32xf32>
    %42 = arith.maximumf %40, %41 : vector<64x32xf32>
    %43 = arith.truncf %42 : vector<64x32xf32> to vector<64x32xbf16>
    %cst_22 = arith.constant dense<0.000000e+00> : vector<64x32xf32>
    %44 = tpu.matmul %43, %28, %cst_22 {dimension_numbers = #tpu.dot_dimension_numbers<[1], [0], [0], [1], [0, 0, 1, 1], [], []>} : vector<64x32xbf16>, vector<32x32xbf16>, vector<64x32xf32> -> vector<64x32xf32>
    %45 = vector.broadcast %32 : vector<1x32xf32> to vector<64x32xf32>
    %46 = arith.addf %44, %45 : vector<64x32xf32>
    %cst_23 = arith.constant 0.000000e+00 : f32
    %47 = vector.broadcast %cst_23 : f32 to vector<64x32xf32>
    %48 = arith.maximumf %46, %47 : vector<64x32xf32>
    %49 = vector.broadcast %33 : vector<1x32xf32> to vector<64x32xf32>
    %50 = arith.mulf %48, %49 : vector<64x32xf32>
    %51 = vector.broadcast %34 : vector<1x32xf32> to vector<64x32xf32>
    %52 = arith.addf %50, %51 : vector<64x32xf32>
    %c0_24 = arith.constant 0 : index
    %c0_25 = arith.constant 0 : index
    %c0_26 = arith.constant 0 : index
    %53 = vector.load %arg4[%c0_24, %c0_25, %c0_26] : memref<4x32x32xbf16, #tpu.memory_space<vmem>>, vector<1x32x32xbf16>
    %54 = vector.shape_cast %53 : vector<1x32x32xbf16> to vector<32x32xbf16>
    %c1 = arith.constant 1 : index
    %c0_27 = arith.constant 0 : index
    %c0_28 = arith.constant 0 : index
    %55 = vector.load %arg5[%c1, %c0_27, %c0_28] : memref<5x32x32xbf16, #tpu.memory_space<vmem>>, vector<1x32x32xbf16>
    %56 = vector.shape_cast %55 : vector<1x32x32xbf16> to vector<32x32xbf16>
    %c1_29 = arith.constant 1 : index
    %c0_30 = arith.constant 0 : index
    %c0_31 = arith.constant 0 : index
    %57 = vector.load %arg6[%c1_29, %c0_30, %c0_31] : memref<5x4x32xf32, #tpu.memory_space<vmem>>, vector<1x4x32xf32>
    %58 = vector.shape_cast %57 : vector<1x4x32xf32> to vector<4x32xf32>
    %59 = vector.extract_strided_slice %58 {offsets = [0, 0], sizes = [1, 32], strides = [1, 1]} : vector<4x32xf32> to vector<1x32xf32>
    %60 = vector.extract_strided_slice %58 {offsets = [1, 0], sizes = [1, 32], strides = [1, 1]} : vector<4x32xf32> to vector<1x32xf32>
    %61 = vector.extract_strided_slice %58 {offsets = [2, 0], sizes = [1, 32], strides = [1, 1]} : vector<4x32xf32> to vector<1x32xf32>
    %62 = vector.extract_strided_slice %58 {offsets = [3, 0], sizes = [1, 32], strides = [1, 1]} : vector<4x32xf32> to vector<1x32xf32>
    %63 = arith.truncf %52 : vector<64x32xf32> to vector<64x32xbf16>
    %cst_32 = arith.constant dense<0.000000e+00> : vector<64x32xf32>
    %64 = tpu.matmul %24, %63, %cst_32 {dimension_numbers = #tpu.dot_dimension_numbers<[1], [0], [0], [1], [0, 0, 1, 1], [], []>} : vector<64x64xbf16>, vector<64x32xbf16>, vector<64x32xf32> -> vector<64x32xf32>
    %65 = arith.truncf %64 : vector<64x32xf32> to vector<64x32xbf16>
    %cst_33 = arith.constant dense<0.000000e+00> : vector<64x32xf32>
    %66 = tpu.matmul %65, %54, %cst_33 {dimension_numbers = #tpu.dot_dimension_numbers<[1], [0], [0], [1], [0, 0, 1, 1], [], []>} : vector<64x32xbf16>, vector<32x32xbf16>, vector<64x32xf32> -> vector<64x32xf32>
    %67 = vector.broadcast %59 : vector<1x32xf32> to vector<64x32xf32>
    %68 = arith.addf %66, %67 : vector<64x32xf32>
    %cst_34 = arith.constant 0.000000e+00 : f32
    %69 = vector.broadcast %cst_34 : f32 to vector<64x32xf32>
    %70 = arith.maximumf %68, %69 : vector<64x32xf32>
    %71 = arith.truncf %70 : vector<64x32xf32> to vector<64x32xbf16>
    %cst_35 = arith.constant dense<0.000000e+00> : vector<64x32xf32>
    %72 = tpu.matmul %71, %56, %cst_35 {dimension_numbers = #tpu.dot_dimension_numbers<[1], [0], [0], [1], [0, 0, 1, 1], [], []>} : vector<64x32xbf16>, vector<32x32xbf16>, vector<64x32xf32> -> vector<64x32xf32>
    %73 = vector.broadcast %60 : vector<1x32xf32> to vector<64x32xf32>
    %74 = arith.addf %72, %73 : vector<64x32xf32>
    %cst_36 = arith.constant 0.000000e+00 : f32
    %75 = vector.broadcast %cst_36 : f32 to vector<64x32xf32>
    %76 = arith.maximumf %74, %75 : vector<64x32xf32>
    %77 = vector.broadcast %61 : vector<1x32xf32> to vector<64x32xf32>
    %78 = arith.mulf %76, %77 : vector<64x32xf32>
    %79 = vector.broadcast %62 : vector<1x32xf32> to vector<64x32xf32>
    %80 = arith.addf %78, %79 : vector<64x32xf32>
    %c1_37 = arith.constant 1 : index
    %c0_38 = arith.constant 0 : index
    %c0_39 = arith.constant 0 : index
    %81 = vector.load %arg4[%c1_37, %c0_38, %c0_39] : memref<4x32x32xbf16, #tpu.memory_space<vmem>>, vector<1x32x32xbf16>
    %82 = vector.shape_cast %81 : vector<1x32x32xbf16> to vector<32x32xbf16>
    %c2 = arith.constant 2 : index
    %c0_40 = arith.constant 0 : index
    %c0_41 = arith.constant 0 : index
    %83 = vector.load %arg5[%c2, %c0_40, %c0_41] : memref<5x32x32xbf16, #tpu.memory_space<vmem>>, vector<1x32x32xbf16>
    %84 = vector.shape_cast %83 : vector<1x32x32xbf16> to vector<32x32xbf16>
    %c2_42 = arith.constant 2 : index
    %c0_43 = arith.constant 0 : index
    %c0_44 = arith.constant 0 : index
    %85 = vector.load %arg6[%c2_42, %c0_43, %c0_44] : memref<5x4x32xf32, #tpu.memory_space<vmem>>, vector<1x4x32xf32>
    %86 = vector.shape_cast %85 : vector<1x4x32xf32> to vector<4x32xf32>
    %87 = vector.extract_strided_slice %86 {offsets = [0, 0], sizes = [1, 32], strides = [1, 1]} : vector<4x32xf32> to vector<1x32xf32>
    %88 = vector.extract_strided_slice %86 {offsets = [1, 0], sizes = [1, 32], strides = [1, 1]} : vector<4x32xf32> to vector<1x32xf32>
    %89 = vector.extract_strided_slice %86 {offsets = [2, 0], sizes = [1, 32], strides = [1, 1]} : vector<4x32xf32> to vector<1x32xf32>
    %90 = vector.extract_strided_slice %86 {offsets = [3, 0], sizes = [1, 32], strides = [1, 1]} : vector<4x32xf32> to vector<1x32xf32>
    %91 = arith.truncf %80 : vector<64x32xf32> to vector<64x32xbf16>
    %cst_45 = arith.constant dense<0.000000e+00> : vector<64x32xf32>
    %92 = tpu.matmul %24, %91, %cst_45 {dimension_numbers = #tpu.dot_dimension_numbers<[1], [0], [0], [1], [0, 0, 1, 1], [], []>} : vector<64x64xbf16>, vector<64x32xbf16>, vector<64x32xf32> -> vector<64x32xf32>
    %93 = arith.truncf %92 : vector<64x32xf32> to vector<64x32xbf16>
    %cst_46 = arith.constant dense<0.000000e+00> : vector<64x32xf32>
    %94 = tpu.matmul %93, %82, %cst_46 {dimension_numbers = #tpu.dot_dimension_numbers<[1], [0], [0], [1], [0, 0, 1, 1], [], []>} : vector<64x32xbf16>, vector<32x32xbf16>, vector<64x32xf32> -> vector<64x32xf32>
    %95 = vector.broadcast %87 : vector<1x32xf32> to vector<64x32xf32>
    %96 = arith.addf %94, %95 : vector<64x32xf32>
    %cst_47 = arith.constant 0.000000e+00 : f32
    %97 = vector.broadcast %cst_47 : f32 to vector<64x32xf32>
    %98 = arith.maximumf %96, %97 : vector<64x32xf32>
    %99 = arith.truncf %98 : vector<64x32xf32> to vector<64x32xbf16>
    %cst_48 = arith.constant dense<0.000000e+00> : vector<64x32xf32>
    %100 = tpu.matmul %99, %84, %cst_48 {dimension_numbers = #tpu.dot_dimension_numbers<[1], [0], [0], [1], [0, 0, 1, 1], [], []>} : vector<64x32xbf16>, vector<32x32xbf16>, vector<64x32xf32> -> vector<64x32xf32>
    %101 = vector.broadcast %88 : vector<1x32xf32> to vector<64x32xf32>
    %102 = arith.addf %100, %101 : vector<64x32xf32>
    %cst_49 = arith.constant 0.000000e+00 : f32
    %103 = vector.broadcast %cst_49 : f32 to vector<64x32xf32>
    %104 = arith.maximumf %102, %103 : vector<64x32xf32>
    %105 = vector.broadcast %89 : vector<1x32xf32> to vector<64x32xf32>
    %106 = arith.mulf %104, %105 : vector<64x32xf32>
    %107 = vector.broadcast %90 : vector<1x32xf32> to vector<64x32xf32>
    %108 = arith.addf %106, %107 : vector<64x32xf32>
    %c2_50 = arith.constant 2 : index
    %c0_51 = arith.constant 0 : index
    %c0_52 = arith.constant 0 : index
    %109 = vector.load %arg4[%c2_50, %c0_51, %c0_52] : memref<4x32x32xbf16, #tpu.memory_space<vmem>>, vector<1x32x32xbf16>
    %110 = vector.shape_cast %109 : vector<1x32x32xbf16> to vector<32x32xbf16>
    %c3 = arith.constant 3 : index
    %c0_53 = arith.constant 0 : index
    %c0_54 = arith.constant 0 : index
    %111 = vector.load %arg5[%c3, %c0_53, %c0_54] : memref<5x32x32xbf16, #tpu.memory_space<vmem>>, vector<1x32x32xbf16>
    %112 = vector.shape_cast %111 : vector<1x32x32xbf16> to vector<32x32xbf16>
    %c3_55 = arith.constant 3 : index
    %c0_56 = arith.constant 0 : index
    %c0_57 = arith.constant 0 : index
    %113 = vector.load %arg6[%c3_55, %c0_56, %c0_57] : memref<5x4x32xf32, #tpu.memory_space<vmem>>, vector<1x4x32xf32>
    %114 = vector.shape_cast %113 : vector<1x4x32xf32> to vector<4x32xf32>
    %115 = vector.extract_strided_slice %114 {offsets = [0, 0], sizes = [1, 32], strides = [1, 1]} : vector<4x32xf32> to vector<1x32xf32>
    %116 = vector.extract_strided_slice %114 {offsets = [1, 0], sizes = [1, 32], strides = [1, 1]} : vector<4x32xf32> to vector<1x32xf32>
    %117 = vector.extract_strided_slice %114 {offsets = [2, 0], sizes = [1, 32], strides = [1, 1]} : vector<4x32xf32> to vector<1x32xf32>
    %118 = vector.extract_strided_slice %114 {offsets = [3, 0], sizes = [1, 32], strides = [1, 1]} : vector<4x32xf32> to vector<1x32xf32>
    %119 = arith.truncf %108 : vector<64x32xf32> to vector<64x32xbf16>
    %cst_58 = arith.constant dense<0.000000e+00> : vector<64x32xf32>
    %120 = tpu.matmul %24, %119, %cst_58 {dimension_numbers = #tpu.dot_dimension_numbers<[1], [0], [0], [1], [0, 0, 1, 1], [], []>} : vector<64x64xbf16>, vector<64x32xbf16>, vector<64x32xf32> -> vector<64x32xf32>
    %121 = arith.truncf %120 : vector<64x32xf32> to vector<64x32xbf16>
    %cst_59 = arith.constant dense<0.000000e+00> : vector<64x32xf32>
    %122 = tpu.matmul %121, %110, %cst_59 {dimension_numbers = #tpu.dot_dimension_numbers<[1], [0], [0], [1], [0, 0, 1, 1], [], []>} : vector<64x32xbf16>, vector<32x32xbf16>, vector<64x32xf32> -> vector<64x32xf32>
    %123 = vector.broadcast %115 : vector<1x32xf32> to vector<64x32xf32>
    %124 = arith.addf %122, %123 : vector<64x32xf32>
    %cst_60 = arith.constant 0.000000e+00 : f32
    %125 = vector.broadcast %cst_60 : f32 to vector<64x32xf32>
    %126 = arith.maximumf %124, %125 : vector<64x32xf32>
    %127 = arith.truncf %126 : vector<64x32xf32> to vector<64x32xbf16>
    %cst_61 = arith.constant dense<0.000000e+00> : vector<64x32xf32>
    %128 = tpu.matmul %127, %112, %cst_61 {dimension_numbers = #tpu.dot_dimension_numbers<[1], [0], [0], [1], [0, 0, 1, 1], [], []>} : vector<64x32xbf16>, vector<32x32xbf16>, vector<64x32xf32> -> vector<64x32xf32>
    %129 = vector.broadcast %116 : vector<1x32xf32> to vector<64x32xf32>
    %130 = arith.addf %128, %129 : vector<64x32xf32>
    %cst_62 = arith.constant 0.000000e+00 : f32
    %131 = vector.broadcast %cst_62 : f32 to vector<64x32xf32>
    %132 = arith.maximumf %130, %131 : vector<64x32xf32>
    %133 = vector.broadcast %117 : vector<1x32xf32> to vector<64x32xf32>
    %134 = arith.mulf %132, %133 : vector<64x32xf32>
    %135 = vector.broadcast %118 : vector<1x32xf32> to vector<64x32xf32>
    %136 = arith.addf %134, %135 : vector<64x32xf32>
    %c3_63 = arith.constant 3 : index
    %c0_64 = arith.constant 0 : index
    %c0_65 = arith.constant 0 : index
    %137 = vector.load %arg4[%c3_63, %c0_64, %c0_65] : memref<4x32x32xbf16, #tpu.memory_space<vmem>>, vector<1x32x32xbf16>
    %138 = vector.shape_cast %137 : vector<1x32x32xbf16> to vector<32x32xbf16>
    %c4 = arith.constant 4 : index
    %c0_66 = arith.constant 0 : index
    %c0_67 = arith.constant 0 : index
    %139 = vector.load %arg5[%c4, %c0_66, %c0_67] : memref<5x32x32xbf16, #tpu.memory_space<vmem>>, vector<1x32x32xbf16>
    %140 = vector.shape_cast %139 : vector<1x32x32xbf16> to vector<32x32xbf16>
    %c4_68 = arith.constant 4 : index
    %c0_69 = arith.constant 0 : index
    %c0_70 = arith.constant 0 : index
    %141 = vector.load %arg6[%c4_68, %c0_69, %c0_70] : memref<5x4x32xf32, #tpu.memory_space<vmem>>, vector<1x4x32xf32>
    %142 = vector.shape_cast %141 : vector<1x4x32xf32> to vector<4x32xf32>
    %143 = vector.extract_strided_slice %142 {offsets = [0, 0], sizes = [1, 32], strides = [1, 1]} : vector<4x32xf32> to vector<1x32xf32>
    %144 = vector.extract_strided_slice %142 {offsets = [1, 0], sizes = [1, 32], strides = [1, 1]} : vector<4x32xf32> to vector<1x32xf32>
    %145 = vector.extract_strided_slice %142 {offsets = [2, 0], sizes = [1, 32], strides = [1, 1]} : vector<4x32xf32> to vector<1x32xf32>
    %146 = vector.extract_strided_slice %142 {offsets = [3, 0], sizes = [1, 32], strides = [1, 1]} : vector<4x32xf32> to vector<1x32xf32>
    %147 = arith.truncf %136 : vector<64x32xf32> to vector<64x32xbf16>
    %cst_71 = arith.constant dense<0.000000e+00> : vector<64x32xf32>
    %148 = tpu.matmul %24, %147, %cst_71 {dimension_numbers = #tpu.dot_dimension_numbers<[1], [0], [0], [1], [0, 0, 1, 1], [], []>} : vector<64x64xbf16>, vector<64x32xbf16>, vector<64x32xf32> -> vector<64x32xf32>
    %149 = arith.truncf %148 : vector<64x32xf32> to vector<64x32xbf16>
    %cst_72 = arith.constant dense<0.000000e+00> : vector<64x32xf32>
    %150 = tpu.matmul %149, %138, %cst_72 {dimension_numbers = #tpu.dot_dimension_numbers<[1], [0], [0], [1], [0, 0, 1, 1], [], []>} : vector<64x32xbf16>, vector<32x32xbf16>, vector<64x32xf32> -> vector<64x32xf32>
    %151 = vector.broadcast %143 : vector<1x32xf32> to vector<64x32xf32>
    %152 = arith.addf %150, %151 : vector<64x32xf32>
    %cst_73 = arith.constant 0.000000e+00 : f32
    %153 = vector.broadcast %cst_73 : f32 to vector<64x32xf32>
    %154 = arith.maximumf %152, %153 : vector<64x32xf32>
    %155 = arith.truncf %154 : vector<64x32xf32> to vector<64x32xbf16>
    %cst_74 = arith.constant dense<0.000000e+00> : vector<64x32xf32>
    %156 = tpu.matmul %155, %140, %cst_74 {dimension_numbers = #tpu.dot_dimension_numbers<[1], [0], [0], [1], [0, 0, 1, 1], [], []>} : vector<64x32xbf16>, vector<32x32xbf16>, vector<64x32xf32> -> vector<64x32xf32>
    %157 = vector.broadcast %144 : vector<1x32xf32> to vector<64x32xf32>
    %158 = arith.addf %156, %157 : vector<64x32xf32>
    %cst_75 = arith.constant 0.000000e+00 : f32
    %159 = vector.broadcast %cst_75 : f32 to vector<64x32xf32>
    %160 = arith.maximumf %158, %159 : vector<64x32xf32>
    %161 = vector.broadcast %145 : vector<1x32xf32> to vector<64x32xf32>
    %162 = arith.mulf %160, %161 : vector<64x32xf32>
    %163 = vector.broadcast %146 : vector<1x32xf32> to vector<64x32xf32>
    %164 = arith.addf %162, %163 : vector<64x32xf32>
    %165 = arith.truncf %164 : vector<64x32xf32> to vector<64x32xbf16>
    %c0_76 = arith.constant 0 : index
    %c0_77 = arith.constant 0 : index
    %166 = vector.load %arg7[%c0_76, %c0_77] : memref<32x1024xbf16, #tpu.memory_space<vmem>>, vector<32x1024xbf16>
    %cst_78 = arith.constant dense<0.000000e+00> : vector<64x1024xf32>
    %167 = tpu.matmul %165, %166, %cst_78 {dimension_numbers = #tpu.dot_dimension_numbers<[1], [0], [0], [1], [0, 0, 1, 1], [], []>} : vector<64x32xbf16>, vector<32x1024xbf16>, vector<64x1024xf32> -> vector<64x1024xf32>
    %c0_79 = arith.constant 0 : index
    %c0_80 = arith.constant 0 : index
    %168 = vector.load %arg8[%c0_79, %c0_80] : memref<1x1024xf32, #tpu.memory_space<vmem>>, vector<1x1024xf32>
    %169 = vector.broadcast %168 : vector<1x1024xf32> to vector<64x1024xf32>
    %170 = arith.addf %167, %169 : vector<64x1024xf32>
    %cst_81 = arith.constant 0.000000e+00 : f32
    %171 = vector.broadcast %cst_81 : f32 to vector<64x1024xf32>
    %172 = arith.maximumf %170, %171 : vector<64x1024xf32>
    %c0_82 = arith.constant 0 : index
    %c0_83 = arith.constant 0 : index
    %173 = vector.load %arg9[%c0_82, %c0_83] : memref<64x1024xf32, #tpu.memory_space<vmem>>, vector<64x1024xf32>
    tpu.vector_store %arg9[%c0_82, %c0_83], %172 {strides = array<i32>} : memref<64x1024xf32, #tpu.memory_space<vmem>>, vector<64x1024xf32>,
    return
  }
}

</mosaic_0001>

<bundles_post_ra>
// kernel: node_gin_conv_net.1
= control target key start
LH: loop header
LB: loop body
LE: loop exit
PB: predicated region body
PF: predicated region fallthrough
CT: control target
= control target key end

     0   :  { %v3224_v2 = vmov 0   ;;  %s3942_s0 = inlined_call_operand.vmem [shape: s32[256,1], index: 0, kind: input, shape index: {}]   ;;  %s3943_s1 = inlined_call_operand.vmem [shape: s32[1,256], index: 1, kind: input, shape index: {}]   ;;  %s3944_s2 = inlined_call_operand.vmem [shape: f32[64,128], index: 2, kind: input, shape index: {}]   ;;  %s3945_s3 = inlined_call_operand.vmem [shape: bf16[128,32], index: 3, kind: input, shape index: {}]   ;;  %s3946_s4 = inlined_call_operand.vmem [shape: bf16[4,32,32], index: 4, kind: input, shape index: {}]   ;;  %s3947_s5 = inlined_call_operand.vmem [shape: bf16[5,32,32], index: 5, kind: input, shape index: {}]   ;;  %s3948_s6 = inlined_call_operand.vmem [shape: f32[5,4,32], index: 6, kind: input, shape index: {}]   ;;  %s3949_s7 = inlined_call_operand.vmem [shape: bf16[32,1024], index: 7, kind: input, shape index: {}]   ;;  %s3950_s8 = inlined_call_operand.vmem [shape: f32[1,1024], index: 8, kind: input, shape index: {}]   ;;  %s3951_s9 = inlined_call_operand.hbm [shape: f32[64,1024], index: 9, kind: output, shape index: {}]  }
   0x1   :  { %v110_v0 = vld [vmem:[%s3942_s0 + $0x80] sm:$0xff]  ;;  %3173 = vset.pattern.permute.xlu1 %v3224_v2  ;;  %3172 = vset.pattern.permute.xlu0 %v3224_v2  ;;  %v111_v3 = vld [vmem:[%s3942_s0 + $0x88] sm:$0xff]  ;;  %v112_v5 = vld [vmem:[%s3942_s0 + $0x90] sm:$0xff] }
   0x2   :  { %v94_v1 = vld [vmem:[%s3942_s0] sm:$0xff]  ;;  %175 = vperm.xlu0 %3172, %v110_v0   ;;  %v95_v4 = vld [vmem:[%s3942_s0 + $0x8] sm:$0xff]  ;;  %v113_v6 = vld [vmem:[%s3942_s0 + $0x98] sm:$0xff] }
   0x3   :  { %127 = vperm.xlu1 %3173, %v94_v1   ;;  %v96_v7 = vld [vmem:[%s3942_s0 + $0x10] sm:$0xff]  ;;  %v97_v8 = vld [vmem:[%s3942_s0 + $0x18] sm:$0xff]  ;;  %v114_v9 = vld [vmem:[%s3942_s0 + $0xa0] sm:$0xff] }
   0x4   :  { %v115_v10 = vld [vmem:[%s3942_s0 + $0xa8] sm:$0xff]  ;;  %v98_v11 = vld [vmem:[%s3942_s0 + $0x20] sm:$0xff]  ;;  %v116_v13 = vld [vmem:[%s3942_s0 + $0xb0] sm:$0xff] }
   0x5   :  { %v99_v12 = vld [vmem:[%s3942_s0 + $0x28] sm:$0xff]  ;;  %v117_v14 = vld [vmem:[%s3942_s0 + $0xb8] sm:$0xff]  ;;  %v100_v15 = vld [vmem:[%s3942_s0 + $0x30] sm:$0xff] }
   0x6   :  { %178 = vperm.xlu0 %3172, %v111_v3   ;;  %v101_v16 = vld [vmem:[%s3942_s0 + $0x38] sm:$0xff] }
   0x7   :  { %130 = vperm.xlu1 %3173, %v95_v4  }
   0xa   :  { %181 = vperm.xlu0 %3172, %v112_v5  }
   0xb   :  { %184 = vperm.xlu1 %3173, %v113_v6  }
   0xe   :  { %133 = vperm.xlu0 %3172, %v96_v7  }
   0xf   :  { %136 = vperm.xlu1 %3173, %v97_v8  }
  0x12   :  { %187 = vperm.xlu0 %3172, %v114_v9  }
  0x13   :  { %190 = vperm.xlu1 %3173, %v115_v10  }
  0x16   :  { %139 = vperm.xlu0 %3172, %v98_v11  }
  0x17   :  { %142 = vperm.xlu1 %3173, %v99_v12  }
  0x1a   :  { %193 = vperm.xlu0 %3172, %v116_v13  }
  0x1b   :  { %196 = vperm.xlu1 %3173, %v117_v14  }
  0x1c   :  { %14 = vsyncpa [#allocation3], 0  ;;  %v118_v17 = vld [vmem:[%s3942_s0 + $0xc0] sm:$0xff]  ;;  %v119_v18 = vld [vmem:[%s3942_s0 + $0xc8] sm:$0xff]  ;;  %v34_v31 = vlaneseq  ;;  %v3225_v39 = vmov 1.0|1.0  }
  0x1d   :  { %v102_v19 = vld [vmem:[%s3942_s0 + $0x40] sm:$0xff]  ;;  %v103_v20 = vld [vmem:[%s3942_s0 + $0x48] sm:$0xff]  ;;  %v120_v21 = vld [vmem:[%s3942_s0 + $0xd0] sm:$0xff] }
  0x1e   :  { %145 = vperm.xlu0 %3172, %v100_v15   ;;  %v121_v22 = vld [vmem:[%s3942_s0 + $0xd8] sm:$0xff]  ;;  %v104_v23 = vld [vmem:[%s3942_s0 + $0x50] sm:$0xff]  ;;  %v122_v25 = vld [vmem:[%s3942_s0 + $0xe0] sm:$0xff]  ;;  %v3378_v34 = vshrl.u32 %v34_v31, 7  ;;  %v3400_v42 = vand.u32 127, %v34_v31 }
  0x1f   :  { %148 = vperm.xlu1 %3173, %v101_v16   ;;  %v105_v24 = vld [vmem:[%s3942_s0 + $0x58] sm:$0xff]  ;;  %v123_v26 = vld [vmem:[%s3942_s0 + $0xe8] sm:$0xff]  ;;  %v106_v27 = vld [vmem:[%s3942_s0 + $0x60] sm:$0xff] }
  0x20   :  { %v107_v28 = vld [vmem:[%s3942_s0 + $0x68] sm:$0xff]  ;;  %v124_v29 = vld [vmem:[%s3942_s0 + $0xf0] sm:$0xff]  ;;  %v125_v30 = vld [vmem:[%s3942_s0 + $0xf8] sm:$0xff]  ;;  %v3381_v35 = vsub.s32 1, %v3378_v34  ;;  %v3389_v37 = vadd.s32 8, %v3378_v34  ;;  %v3442_v6 = vsub.s32 0, %v3378_v34 }
  0x21   :  { %v108_v32 = vld [vmem:[%s3942_s0 + $0x70] sm:$0xff]  ;;  %v109_v33 = vld [vmem:[%s3942_s0 + $0x78] sm:$0xff]  ;;  %v3386_v36 = vld [vmem:[%s3943_s1] sm:$0x3]  ;;  %v3452_v10 = vadd.s32 16, %v3378_v34  ;;  %v3455_v11 = vadd.s32 24, %v3378_v34 }
  0x22   :  { %199 = vperm.xlu0 %3172, %v118_v17   ;;  %v3393_v38 = vrot.slane %v3386_v36, %v3381_v35  ;;  %v47_v9 = vrot.slane %v3386_v36, %v3442_v6  ;;  %v3468_v14 = vadd.s32 32, %v3378_v34  ;;  %v3471_v15 = vadd.s32 40, %v3378_v34 }
  0x23   :  { %202 = vperm.xlu1 %3173, %v119_v18   ;;  %v3482_v16 = vadd.s32 48, %v3378_v34  ;;  %v3485_v17 = vadd.s32 56, %v3378_v34  ;;  %v387_v18 = vld [vmem:[%s3944_s2] sm:$0xff] }
  0x24   :  { %vm53_vm0 = vcmp.eq.s32.totalorder %v3393_v38, %v3378_v34  ;;  %vm55_vm1 = vcmp.eq.s32.totalorder %v3393_v38, %v3389_v37 }
  0x25   :  { %vm2638_vm2 = vmpackc.low %vm55_vm1, %vm53_vm0 }
  0x26   :  { %151 = vperm.xlu0 %3172, %v102_v19   ;;  %2639 = vmatprep.mubr.msk.bf16.mxu0 %vm2638_vm2, %v3225_v39  ;;  %v388_v19 = vld [vmem:[%s3944_s2 + $0x8] sm:$0xff] }
  0x27   :  { %154 = vperm.xlu1 %3173, %v103_v20   ;;  %v416_v20 = vpack.c.bf16 %v388_v19, %v387_v18 }
  0x29   :  { %2946 = vmatprep.subr.bf16.mxu1 %v416_v20 }
  0x2a   :  { %205 = vperm.xlu0 %3172, %v120_v21   ;;  %2947 = vmatpush3.bf16.msra.mxu1 %v416_v20  ;;  %v389_v21 = vld [vmem:[%s3944_s2 + $0x10] sm:$0xff]  ;;  %v3179_v20 = vld [vmem:[%s3945_s3 + $0x28] sm:$0xff]  }
  0x2b   :  { %208 = vperm.xlu1 %3173, %v121_v22   ;;  %v390_v22 = vld [vmem:[%s3944_s2 + $0x18] sm:$0xff] }
  0x2e   :  { %157 = vperm.xlu0 %3172, %v104_v23   ;;  %v417_v23 = vpack.c.bf16 %v390_v22, %v389_v21  ;;  %v3180_v21 = vld [vmem:[%s3945_s3 + $0x30] sm:$0xff]   ;;  %v3181_v22 = vld [vmem:[%s3945_s3 + $0x38] sm:$0xff]  }
  0x2f   :  { %160 = vperm.xlu1 %3173, %v105_v24   ;;  %v391_v24 = vld [vmem:[%s3944_s2 + $0x20] sm:$0xff] }
  0x30   :  { %2948 = vmatprep.subr.bf16.mxu1 %v417_v23 }
  0x31   :  { %2949 = vmatpush3.bf16.msra.mxu1 %v417_v23  ;;  %v3182_v23 = vld [vmem:[%s3947_s5] sm:$0xff]  }
  0x32   :  { %211 = vperm.xlu0 %3172, %v122_v25   ;;  %v392_v25 = vld [vmem:[%s3944_s2 + $0x28] sm:$0xff] }
  0x33   :  { %214 = vperm.xlu1 %3173, %v123_v26   ;;  %v418_v26 = vpack.c.bf16 %v392_v25, %v391_v24 }
  0x35   :  { %2950 = vmatprep.subr.bf16.mxu1 %v418_v26 }
  0x36   :  { %163 = vperm.xlu0 %3172, %v106_v27   ;;  %2951 = vmatpush3.bf16.msra.mxu1 %v418_v26  ;;  %v393_v27 = vld [vmem:[%s3944_s2 + $0x30] sm:$0xff] }
  0x37   :  { %166 = vperm.xlu1 %3173, %v107_v28   ;;  %v394_v28 = vld [vmem:[%s3944_s2 + $0x38] sm:$0xff] }
  0x3a   :  { %217 = vperm.xlu0 %3172, %v124_v29   ;;  %v419_v29 = vpack.c.bf16 %v394_v28, %v393_v27 }
  0x3b   :  { %220 = vperm.xlu1 %3173, %v125_v30   ;;  %v3174_v30 = vld [vmem:[%s3945_s3] sm:$0xff]  }
  0x3c   :  { %2952 = vmatprep.subr.bf16.mxu1 %v419_v29 }
  0x3d   :  { %2953 = vmatpush3.bf16.msra.mxu1 %v419_v29 }
  0x3e   :  { %169 = vperm.xlu0 %3172, %v108_v32   ;;  %2962 = vmatprep.subr.bf16.mxu1 %v3174_v30 }
  0x3f   :  { %172 = vperm.xlu1 %3173, %v109_v33  }
  0x81   :  { %v176_v40 = vpop.permute.xlu0 %175 }
  0x82   :  { %v128_v41 = vpop.permute.xlu1 %127  ;;  %vm238_vm6 = vcmp.eq.s32.totalorder %v176_v40, %v3400_v42 }
  0x83   :  { %vm222_vm3 = vcmp.eq.s32.totalorder %v128_v41, %v3400_v42 }
  0x85   :  { %v179_v43 = vpop.permute.xlu0 %178 }
  0x86   :  { %v131_v44 = vpop.permute.xlu1 %130  ;;  %vm239_vm4 = vcmp.eq.s32.totalorder %v179_v43, %v3400_v42 }
  0x87   :  { %vm223_vm5 = vcmp.eq.s32.totalorder %v131_v44, %v3400_v42  ;;  %vm2622_vm8 = vmpackc.low %vm239_vm4, %vm238_vm6 }
  0x88   :  { %vm2606_vm7 = vmpackc.low %vm223_vm5, %vm222_vm3  ;;  %2800 = vmatprep.subr.msk.bf16.mxu0 %vm2622_vm8, %v3225_v39 }
  0x89   :  { %v182_v45 = vpop.permute.xlu0 %181  ;;  %2801 = vmatpush3.bf16.msk.msra.mxu0 %vm2606_vm7, %v3225_v39 }
  0x8a   :  { %v185_v46 = vpop.permute.xlu1 %184  ;;  %vm240_vm9 = vcmp.eq.s32.totalorder %v182_v45, %v3400_v42 }
  0x8b   :  { %vm241_vm10 = vcmp.eq.s32.totalorder %v185_v46, %v3400_v42 }
  0x8c   :  { %vm2624_vm11 = vmpackc.low %vm241_vm10, %vm240_vm9 }
  0x8d   :  { %2802 = vmatprep.subr.msk.bf16.mxu0 %vm2624_vm11, %v3225_v39  ;;  %v134_v47 = vpop.permute.xlu0 %133 }
  0x8e   :  { %v137_v48 = vpop.permute.xlu1 %136  ;;  %vm224_vm12 = vcmp.eq.s32.totalorder %v134_v47, %v3400_v42 }
  0x8f   :  { %vm225_vm13 = vcmp.eq.s32.totalorder %v137_v48, %v3400_v42 }
  0x90   :  { %vm2608_vm14 = vmpackc.low %vm225_vm13, %vm224_vm12 }
  0x91   :  { %2803 = vmatpush3.bf16.msk.msra.mxu0 %vm2608_vm14, %v3225_v39  ;;  %v188_v49 = vpop.permute.xlu0 %187 }
  0x92   :  { %v191_v50 = vpop.permute.xlu1 %190  ;;  %vm242_vm15 = vcmp.eq.s32.totalorder %v188_v49, %v3400_v42 }
  0x93   :  { %vm243_vm0 = vcmp.eq.s32.totalorder %v191_v50, %v3400_v42 }
  0x94   :  { %vm2626_vm1 = vmpackc.low %vm243_vm0, %vm242_vm15 }
  0x95   :  { %2804 = vmatprep.subr.msk.bf16.mxu0 %vm2626_vm1, %v3225_v39  ;;  %v140_v51 = vpop.permute.xlu0 %139 }
  0x96   :  { %v143_v52 = vpop.permute.xlu1 %142  ;;  %vm226_vm2 = vcmp.eq.s32.totalorder %v140_v51, %v3400_v42 }
  0x97   :  { %vm227_vm3 = vcmp.eq.s32.totalorder %v143_v52, %v3400_v42 }
  0x98   :  { %vm2610_vm4 = vmpackc.low %vm227_vm3, %vm226_vm2 }
  0x99   :  { %2805 = vmatpush3.bf16.msk.msra.mxu0 %vm2610_vm4, %v3225_v39  ;;  %v194_v53 = vpop.permute.xlu0 %193 }
  0x9a   :  { %v197_v54 = vpop.permute.xlu1 %196  ;;  %vm244_vm5 = vcmp.eq.s32.totalorder %v194_v53, %v3400_v42 }
  0x9b   :  { %vm245_vm6 = vcmp.eq.s32.totalorder %v197_v54, %v3400_v42 }
  0x9c   :  { %vm2628_vm7 = vmpackc.low %vm245_vm6, %vm244_vm5 }
  0x9d   :  { %2806 = vmatprep.subr.msk.bf16.mxu0 %vm2628_vm7, %v3225_v39  ;;  %v146_v55 = vpop.permute.xlu0 %145 }
  0x9e   :  { %v149_v56 = vpop.permute.xlu1 %148  ;;  %vm228_vm8 = vcmp.eq.s32.totalorder %v146_v55, %v3400_v42 }
  0x9f   :  { %vm229_vm9 = vcmp.eq.s32.totalorder %v149_v56, %v3400_v42 }
  0xa0   :  { %vm2612_vm10 = vmpackc.low %vm229_vm9, %vm228_vm8 }
  0xa1   :  { %2807 = vmatpush3.bf16.msk.msra.mxu0 %vm2612_vm10, %v3225_v39  ;;  %v200_v57 = vpop.permute.xlu0 %199 }
  0xa2   :  { %v203_v58 = vpop.permute.xlu1 %202  ;;  %vm246_vm11 = vcmp.eq.s32.totalorder %v200_v57, %v3400_v42 }
  0xa3   :  { %vm247_vm12 = vcmp.eq.s32.totalorder %v203_v58, %v3400_v42  ;;  %v3175_v58 = vld [vmem:[%s3945_s3 + $0x8] sm:$0xff]  }
  0xa4   :  { %vm2630_vm13 = vmpackc.low %vm247_vm12, %vm246_vm11 }
  0xa5   :  { %2808 = vmatprep.subr.msk.bf16.mxu0 %vm2630_vm13, %v3225_v39  ;;  %v152_v59 = vpop.permute.xlu0 %151 }
  0xa6   :  { %v155_v60 = vpop.permute.xlu1 %154  ;;  %vm230_vm14 = vcmp.eq.s32.totalorder %v152_v59, %v3400_v42 }
  0xa7   :  { %vm231_vm15 = vcmp.eq.s32.totalorder %v155_v60, %v3400_v42 }
  0xa8   :  { %vm2614_vm0 = vmpackc.low %vm231_vm15, %vm230_vm14 }
  0xa9   :  { %2809 = vmatpush3.bf16.msk.msra.mxu0 %vm2614_vm0, %v3225_v39  ;;  %v206_v61 = vpop.permute.xlu0 %205  ;;  %vm52_vm0 = vcmp.eq.s32.totalorder %v47_v9, %v3378_v34 }
  0xaa   :  { %v209_v62 = vpop.permute.xlu1 %208  ;;  %vm248_vm1 = vcmp.eq.s32.totalorder %v206_v61, %v3400_v42 }
  0xab   :  { %vm249_vm2 = vcmp.eq.s32.totalorder %v209_v62, %v3400_v42 }
  0xac   :  { %vm2632_vm3 = vmpackc.low %vm249_vm2, %vm248_vm1  ;;  %vm54_vm1 = vcmp.eq.s32.totalorder %v47_v9, %v3389_v37 }
  0xad   :  { %2810 = vmatprep.subr.msk.bf16.mxu0 %vm2632_vm3, %v3225_v39  ;;  %v158_v63 = vpop.permute.xlu0 %157 }
  0xae   :  { %v161_v0 = vpop.permute.xlu1 %160  ;;  %vm232_vm4 = vcmp.eq.s32.totalorder %v158_v63, %v3400_v42 }
  0xaf   :  { %vm233_vm5 = vcmp.eq.s32.totalorder %v161_v0, %v3400_v42 }
  0xb0   :  { %vm2616_vm6 = vmpackc.low %vm233_vm5, %vm232_vm4  ;;  %vm57_vm4 = vcmp.eq.s32.totalorder %v3393_v38, %v3452_v10  ;;  %vm59_vm5 = vcmp.eq.s32.totalorder %v3393_v38, %v3455_v11 }
  0xb1   :  { %2811 = vmatpush3.bf16.msk.msra.mxu0 %vm2616_vm6, %v3225_v39  ;;  %v212_v1 = vpop.permute.xlu0 %211 }
  0xb2   :  { %v215_v3 = vpop.permute.xlu1 %214  ;;  %vm250_vm7 = vcmp.eq.s32.totalorder %v212_v1, %v3400_v42 }
  0xb3   :  { %vm251_vm8 = vcmp.eq.s32.totalorder %v215_v3, %v3400_v42  ;;  %v3176_v3 = vld [vmem:[%s3945_s3 + $0x10] sm:$0xff]  }
  0xb4   :  { %vm2634_vm9 = vmpackc.low %vm251_vm8, %vm250_vm7 }
  0xb5   :  { %2812 = vmatprep.subr.msk.bf16.mxu0 %vm2634_vm9, %v3225_v39  ;;  %v164_v4 = vpop.permute.xlu0 %163  ;;  %vm2640_vm7 = vmpackc.low %vm54_vm1, %vm52_vm0  ;;  %vm56_vm9 = vcmp.eq.s32.totalorder %v47_v9, %v3452_v10  ;;  %vm62_vm0 = vcmp.eq.s32.totalorder %v47_v9, %v3471_v15  ;;  %vm65_vm1 = vcmp.eq.s32.totalorder %v3393_v38, %v3482_v16 }
  0xb6   :  { %v167_v5 = vpop.permute.xlu1 %166  ;;  %vm234_vm10 = vcmp.eq.s32.totalorder %v164_v4, %v3400_v42  ;;  %vm2642_vm8 = vmpackc.low %vm59_vm5, %vm57_vm4  ;;  %vm64_vm5 = vcmp.eq.s32.totalorder %v47_v9, %v3482_v16 }
  0xb7   :  { %vm235_vm11 = vcmp.eq.s32.totalorder %v167_v5, %v3400_v42 }
  0xb8   :  { %vm2618_vm12 = vmpackc.low %vm235_vm11, %vm234_vm10  ;;  %vm58_vm10 = vcmp.eq.s32.totalorder %v47_v9, %v3455_v11  ;;  %vm61_vm11 = vcmp.eq.s32.totalorder %v3393_v38, %v3468_v14 }
  0xb9   :  { %2813 = vmatpush3.bf16.msk.msra.mxu0 %vm2618_vm12, %v3225_v39  ;;  %v218_v7 = vpop.permute.xlu0 %217  ;;  %vm63_vm12 = vcmp.eq.s32.totalorder %v3393_v38, %v3471_v15 }
  0xba   :  { %v221_v8 = vpop.permute.xlu1 %220  ;;  %vm252_vm13 = vcmp.eq.s32.totalorder %v218_v7, %v3400_v42 }
  0xbb   :  { %vm253_vm14 = vcmp.eq.s32.totalorder %v221_v8, %v3400_v42 }
  0xbc   :  { %vm2636_vm15 = vmpackc.low %vm253_vm14, %vm252_vm13 }
  0xbd   :  { %2814 = vmatprep.subr.msk.bf16.mxu0 %vm2636_vm15, %v3225_v39  ;;  %v170_v12 = vpop.permute.xlu0 %169  ;;  %vm2644_vm13 = vmpackc.low %vm58_vm10, %vm56_vm9  ;;  %vm60_vm15 = vcmp.eq.s32.totalorder %v47_v9, %v3468_v14  ;;  %vm303_vm9 = vcmp.eq.s32.totalorder %v3389_v37, %v3400_v42  ;;  %vm420_vm10 = vcmask 523264  }
  0xbe   :  { %v173_v13 = vpop.permute.xlu1 %172  ;;  %vm236_vm2 = vcmp.eq.s32.totalorder %v170_v12, %v3400_v42  ;;  %vm2646_vm14 = vmpackc.low %vm63_vm12, %vm61_vm11  ;;  %vm304_vm11 = vcmp.eq.s32.totalorder %v3452_v10, %v3400_v42  ;;  %vm305_vm12 = vcmp.eq.s32.totalorder %v3455_v11, %v3400_v42 }
  0xbf   :  { %vm237_vm3 = vcmp.eq.s32.totalorder %v173_v13, %v3400_v42 }
  0xc0   :  { %vm2620_vm6 = vmpackc.low %vm237_vm3, %vm236_vm2  ;;  %vm67_vm2 = vcmp.eq.s32.totalorder %v3393_v38, %v3485_v17  ;;  %v3226_v38 = vmov 0.0  }
  0xc1   :  { %2815 = vmatpush3.bf16.msk.msra.mxu0 %vm2620_vm6, %v3225_v39  ;;  %vm2648_vm3 = vmpackc.low %vm62_vm0, %vm60_vm15  ;;  %vm66_vm6 = vcmp.eq.s32.totalorder %v47_v9, %v3485_v17  ;;  %v311_v40 = vsel %vm303_vm9, 1.0, %v3226_v38  ;;  %v312_v50 = vsel %vm304_vm11, 1.0, %v3226_v38  ;;  %v313_v51 = vsel %vm305_vm12, 1.0, %v3226_v38  ;;  %v3177_v9 = vld [vmem:[%s3945_s3 + $0x18] sm:$0xff]  }
  0xc2   :  { %vm2650_vm4 = vmpackc.low %vm67_vm2, %vm65_vm1  ;;  %vm308_vm15 = vcmp.eq.s32.totalorder %v3482_v16, %v3400_v42  ;;  %vm309_vm0 = vcmp.eq.s32.totalorder %v3485_v17, %v3400_v42  ;;  %2986 = vmatprep.subr.bf16.mxu0 %v3182_v23  ;;  %vm647_vm1 = vcmask 261120  }
  0xc3   :  { %v316_v13 = vsel %vm308_vm15, 1.0, %v3226_v38 }
  0xc4   :  { %2641 = vmatmul.mubr.msk.bf16.vlgmr.msra.gmra.mrb[0].mxu0 %vm2640_vm7, %v3225_v39  ;;  %vm2652_vm7 = vmpackc.low %vm66_vm6, %vm64_vm5 }
  0xc5   :  { %2643 = vmatprep.mubr.msk.bf16.mxu0 %vm2642_vm8, %v3225_v39  ;;  %vm302_vm8 = vcmp.eq.s32.totalorder %v3378_v34, %v3400_v42  ;;  %2987 = vmatpush3.bf16.msra.mxu0 %v3182_v23 }
  0xcc   :  { %2645 = vmatmul.mubr.msk.bf16.gmra.mrb[4].mxu0 %vm2644_vm13, %v3225_v39  ;;  %vm306_vm13 = vcmp.eq.s32.totalorder %v3468_v14, %v3400_v42  ;;  %v317_v14 = vsel %vm309_vm0, 1.0, %v3226_v38 }
  0xcd   :  { %2647 = vmatprep.mubr.msk.bf16.mxu0 %vm2646_vm14, %v3225_v39  ;;  %vm307_vm14 = vcmp.eq.s32.totalorder %v3471_v15, %v3400_v42  ;;  %v314_v62 = vsel %vm306_vm13, 1.0, %v3226_v38  ;;  %v3178_v42 = vld [vmem:[%s3945_s3 + $0x20] sm:$0xff]  }
  0xce   :  { %v315_v63 = vsel %vm307_vm14, 1.0, %v3226_v38 }
  0xd4   :  { %2649 = vmatmul.mubr.msk.bf16.gmra.mrb[8].mxu0 %vm2648_vm3, %v3225_v39 }
  0xd5   :  { %2651 = vmatprep.mubr.msk.bf16.mxu0 %vm2650_vm4, %v3225_v39 }
  0xdc   :  { %2653 = vmatmul.mubr.msk.bf16.gmra.mrb[12].mxu0 %vm2652_vm7, %v3225_v39  ;;  %v310_v39 = vsel %vm302_vm8, 1.0, %v3226_v38 }
 0x197   :  { %v2816_v31 = vpop.f32.mrb[0].mxu0 }
 0x198   :  { %v2817_v32 = vpop.f32.mrb[1].mxu0 }
 0x199   :  { %v2818_v33 = vadd.f32 %v2817_v32, %v2816_v31  ;;  %v2819_v36 = vpop.f32.mrb[2].mxu0 }
 0x19a   :  { %v2820_v41 = vpop.f32.mrb[3].mxu0 }
 0x19b   :  { %v2821_v43 = vadd.f32 %v2820_v41, %v2819_v36  ;;  %v353_v44 = vadd.f32 %v2818_v33, %v310_v39  ;;  %v3183_v39 = vld [vmem:[%s3947_s5 + $0x8] sm:$0xff]  }
 0x19c   :  { %2988 = vmatprep.subr.bf16.mxu0 %v3183_v39 }
 0x19d   :  { %v356_v45 = vadd.f32 %v2821_v43, %v311_v40  ;;  %2989 = vmatpush3.bf16.msra.mxu0 %v3183_v39  ;;  %v415_v40 = vld [vmem:[%s3948_s6] sm:$0xf] }
 0x19e   :  { %v505_v41 = vrot.slane %v415_v40, %v3442_v6 }
 0x19f   :  { %v3531_v46 = vpack.c.bf16 %v356_v45, %v353_v44  ;;  %v2822_v47 = vpop.f32.mrb[4].mxu0 }
 0x1a0   :  { %v2823_v37 = vpop.f32.mrb[5].mxu0 }
 0x1a1   :  { %v2824_v48 = vadd.f32 %v2823_v37, %v2822_v47  ;;  %v2825_v49 = vpop.f32.mrb[6].mxu0  ;;  %2954 = vmatprep.mubr.msk.bf16.mxu1 %vm420_vm10, %v3531_v46 }
 0x1a2   :  { %v2826_v52 = vpop.f32.mrb[7].mxu0 }
 0x1a3   :  { %v2827_v53 = vadd.f32 %v2826_v52, %v2825_v49  ;;  %v361_v54 = vadd.f32 %v2824_v48, %v312_v50 }
 0x1a5   :  { %v364_v55 = vadd.f32 %v2827_v53, %v313_v51 }
 0x1a7   :  { %v3539_v56 = vpack.c.bf16 %v364_v55, %v361_v54  ;;  %v2828_v57 = vpop.f32.mrb[8].mxu0 }
 0x1a8   :  { %v2829_v59 = vpop.f32.mrb[9].mxu0 }
 0x1a9   :  { %v2830_v60 = vadd.f32 %v2829_v59, %v2828_v57  ;;  %v2831_v61 = vpop.f32.mrb[10].mxu0  ;;  %2955 = vmatmul.mubr.msk.bf16.vlgmr.msra.gmra.mrb[0].mxu1 %vm420_vm10, %v3539_v56 }
 0x1aa   :  { %v2832_v0 = vpop.f32.mrb[11].mxu0  ;;  %2963 = vmatpush3.bf16.msra.mxu1 %v3174_v30 }
 0x1ab   :  { %v2833_v1 = vadd.f32 %v2832_v0, %v2831_v61  ;;  %2964 = vmatprep.subr.bf16.mxu1 %v3175_v58  ;;  %v369_v4 = vadd.f32 %v2830_v60, %v314_v62 }
 0x1ad   :  { %v372_v5 = vadd.f32 %v2833_v1, %v315_v63 }
 0x1ae   :  { %2965 = vmatpush3.bf16.msra.mxu1 %v3175_v58 }
 0x1af   :  { %v3553_v7 = vpack.c.bf16 %v372_v5, %v369_v4  ;;  %v2834_v8 = vpop.f32.mrb[12].mxu0  ;;  %2966 = vmatprep.subr.bf16.mxu1 %v3176_v3 }
 0x1b0   :  { %v2835_v10 = vpop.f32.mrb[13].mxu0 }
 0x1b1   :  { %v2836_v11 = vadd.f32 %v2835_v10, %v2834_v8  ;;  %v2837_v12 = vpop.f32.mrb[14].mxu0  ;;  %2958 = vmatprep.mubr.msk.bf16.mxu1 %vm420_vm10, %v3553_v7 }
 0x1b2   :  { %v2838_v15 = vpop.f32.mrb[15].mxu0  ;;  %2967 = vmatpush3.bf16.msra.mxu1 %v3176_v3 }
 0x1b3   :  { %v2839_v18 = vadd.f32 %v2838_v15, %v2837_v12  ;;  %2968 = vmatprep.subr.bf16.mxu1 %v3177_v9  ;;  %v377_v16 = vadd.f32 %v2836_v11, %v316_v13  ;;  %v3184_v11 = vld [vmem:[%s3946_s4] sm:$0xff]   ;;  %v3185_v12 = vld [vmem:[%s3946_s4 + $0x8] sm:$0xff]   ;;  %v634_v13 = vrot.slane %v415_v40, %v3381_v35 }
 0x1b4   :  { %3014 = vmatprep.subr.bf16.mxu0 %v3184_v11 }
 0x1b5   :  { %v380_v17 = vadd.f32 %v2839_v18, %v317_v14  ;;  %v3604_v14 = vsub.s32 2, %v3378_v34 }
 0x1b6   :  { %2969 = vmatpush3.bf16.msra.mxu1 %v3177_v9 }
 0x1b7   :  { %v3567_v19 = vpack.c.bf16 %v380_v17, %v377_v16  ;;  %2970 = vmatprep.subr.bf16.mxu1 %v3178_v42  ;;  %v3608_v16 = vsub.s32 3, %v3378_v34 }
 0x1b9   :  { %2959 = vmatmul.mubr.msk.bf16.gmra.mrb[4].mxu1 %vm420_vm10, %v3567_v19 }
 0x1ba   :  { %2971 = vmatpush3.bf16.msra.mxu1 %v3178_v42  ;;  %v736_v42 = vrot.slane %v415_v40, %v3604_v14 }
 0x1bb   :  { %2972 = vmatprep.subr.bf16.mxu1 %v3179_v20 }
 0x1be   :  { %2973 = vmatpush3.bf16.msra.mxu1 %v3179_v20 }
 0x1bf   :  { %2974 = vmatprep.subr.bf16.mxu1 %v3180_v21 }
 0x1c2   :  { %2975 = vmatpush3.bf16.msra.mxu1 %v3180_v21 }
 0x1c3   :  { %2976 = vmatprep.subr.bf16.mxu1 %v3181_v22 }
 0x1c6   :  { %2977 = vmatpush3.bf16.msra.mxu1 %v3181_v22 }
 0x27c   :  { %v2956_v24 = vpop.f32.mrb[0].mxu1 }
 0x27d   :  { %v467_v25 = vpop.f32.mrb[1].mxu1 }
 0x27e   :  { %v2957_v26 = vpop.f32.mrb[2].mxu1 }
 0x27f   :  { %v499_v27 = vpack.c.bf16 %v2957_v26, %v2956_v24  ;;  %v470_v28 = vpop.f32.mrb[3].mxu1 }
 0x280   :  { %v498_v29 = vpack.c.bf16 %v470_v28, %v467_v25  ;;  %v748_v28 = vrot.slane %v415_v40, %v3608_v16 }
 0x282   :  { %2978 = vmatprep.mubr.bf16.mxu1 %v498_v29 }
 0x283   :  { %2979 = vmatmul.mubr.bf16.vlgmr.msra.gmra.mrb[8].mxu1 %v499_v27 }
 0x28c   :  { %v2960_v30 = vpop.f32.mrb[4].mxu1 }
 0x28d   :  { %v483_v31 = vpop.f32.mrb[5].mxu1 }
 0x28e   :  { %v2961_v32 = vpop.f32.mrb[6].mxu1 }
 0x28f   :  { %v501_v33 = vpack.c.bf16 %v2961_v32, %v2960_v30  ;;  %v486_v36 = vpop.f32.mrb[7].mxu1 }
 0x290   :  { %v500_v38 = vpack.c.bf16 %v486_v36, %v483_v31 }
 0x292   :  { %2982 = vmatprep.mubr.bf16.mxu1 %v500_v38 }
 0x293   :  { %2983 = vmatmul.mubr.bf16.gmra.mrb[12].mxu1 %v501_v33 }
 0x294   :  { %3006 = vmatprep.mubr.msk.bf16.mxu1 %vm420_vm10, %v3531_v46 }
 0x356   :  { %v2980_v43 = vpop.f32.mrb[8].mxu1 }
 0x357   :  { %v597_v44 = vadd.f32 %v2980_v43, %v505_v41  ;;  %v588_v45 = vpop.f32.mrb[9].mxu1 }
 0x358   :  { %v589_v47 = vadd.f32 %v588_v45, %v505_v41  ;;  %v2981_v37 = vpop.f32.mrb[10].mxu1 }
 0x359   :  { %v600_v48 = vadd.f32 %v2981_v37, %v505_v41  ;;  %v591_v49 = vpop.f32.mrb[11].mxu1  ;;  %v621_v51 = vmax.f32 %v597_v44, 0.0 }
 0x35a   :  { %v592_v50 = vadd.f32 %v591_v49, %v505_v41  ;;  %v619_v53 = vmax.f32 %v589_v47, 0.0 }
 0x35b   :  { %v622_v52 = vmax.f32 %v600_v48, 0.0 }
 0x35c   :  { %v620_v54 = vmax.f32 %v592_v50, 0.0 }
 0x35d   :  { %v628_v55 = vpack.c.bf16 %v622_v52, %v621_v51 }
 0x35e   :  { %v627_v57 = vpack.c.bf16 %v620_v54, %v619_v53 }
 0x360   :  { %2990 = vmatprep.mubr.msk.bf16.mxu0 %vm647_vm1, %v627_v57 }
 0x361   :  { %2991 = vmatmul.mubr.msk.bf16.vlgmr.msra.gmra.mrb[16].mxu0 %vm647_vm1, %v628_v55 }
 0x362   :  { %3015 = vmatpush3.bf16.msra.mxu0 %v3184_v11 }
 0x363   :  { %3016 = vmatprep.subr.bf16.mxu0 %v3185_v12 }
 0x366   :  { %v2984_v58 = vpop.f32.mrb[12].mxu1  ;;  %3017 = vmatpush3.bf16.msra.mxu0 %v3185_v12 }
 0x367   :  { %v613_v59 = vadd.f32 %v2984_v58, %v505_v41  ;;  %v604_v60 = vpop.f32.mrb[13].mxu1 }
 0x368   :  { %v605_v61 = vadd.f32 %v604_v60, %v505_v41  ;;  %v2985_v62 = vpop.f32.mrb[14].mxu1 }
 0x369   :  { %v616_v63 = vadd.f32 %v2985_v62, %v505_v41  ;;  %v607_v0 = vpop.f32.mrb[15].mxu1  ;;  %v625_v3 = vmax.f32 %v613_v59, 0.0 }
 0x36a   :  { %v608_v1 = vadd.f32 %v607_v0, %v505_v41  ;;  %v623_v5 = vmax.f32 %v605_v61, 0.0 }
 0x36b   :  { %v626_v4 = vmax.f32 %v616_v63, 0.0 }
 0x36c   :  { %v624_v8 = vmax.f32 %v608_v1, 0.0 }
 0x36d   :  { %v630_v9 = vpack.c.bf16 %v626_v4, %v625_v3  ;;  %v3186_v4 = vld [vmem:[%s3947_s5 + $0x10] sm:$0xff]  }
 0x36e   :  { %v629_v10 = vpack.c.bf16 %v624_v8, %v623_v5 }
 0x370   :  { %2994 = vmatprep.mubr.msk.bf16.mxu0 %vm647_vm1, %v629_v10 }
 0x371   :  { %2995 = vmatmul.mubr.msk.bf16.gmra.mrb[20].mxu0 %vm647_vm1, %v630_v9 }
 0x434   :  { %v2992_v15 = vpop.f32.mrb[16].mxu0 }
 0x435   :  { %v703_v18 = vadd.f32 %v2992_v15, %v634_v13  ;;  %v694_v17 = vpop.f32.mrb[17].mxu0 }
 0x436   :  { %v695_v20 = vadd.f32 %v694_v17, %v634_v13  ;;  %v2993_v21 = vpop.f32.mrb[18].mxu0 }
 0x437   :  { %v727_v22 = vmax.f32 %v703_v18, 0.0  ;;  %v706_v23 = vadd.f32 %v2993_v21, %v634_v13  ;;  %v697_v24 = vpop.f32.mrb[19].mxu0  ;;  %v3187_v21 = vld [vmem:[%s3947_s5 + $0x18] sm:$0xff]  }
 0x438   :  { %v725_v25 = vmax.f32 %v695_v20, 0.0  ;;  %v698_v26 = vadd.f32 %v697_v24, %v634_v13 }
 0x439   :  { %v739_v27 = vmul.f32 %v736_v42, %v727_v22  ;;  %v728_v29 = vmax.f32 %v706_v23, 0.0  ;;  %v2676_v22 = vld [vmem:[%s3948_s6 + $0x4] sm:$0xf] }
 0x43a   :  { %v737_v30 = vmul.f32 %v736_v42, %v725_v25  ;;  %v726_v31 = vmax.f32 %v698_v26, 0.0  ;;  %v844_v23 = vrot.slane %v2676_v22, %v3442_v6 }
 0x43b   :  { %v740_v32 = vmul.f32 %v736_v42, %v728_v29  ;;  %v751_v36 = vadd.f32 %v748_v28, %v739_v27 }
 0x43c   :  { %v738_v33 = vmul.f32 %v736_v42, %v726_v31  ;;  %v749_v39 = vadd.f32 %v748_v28, %v737_v30 }
 0x43d   :  { %v752_v38 = vadd.f32 %v748_v28, %v740_v32 }
 0x43e   :  { %v750_v41 = vadd.f32 %v748_v28, %v738_v33 }
 0x43f   :  { %v769_v43 = vpack.c.bf16 %v752_v38, %v751_v36 }
 0x440   :  { %v768_v44 = vpack.c.bf16 %v750_v41, %v749_v39 }
 0x442   :  { %2998 = vmatprep.subr.bf16.mxu1 %v768_v44 }
 0x443   :  { %2999 = vmatpush3.bf16.msra.mxu1 %v768_v44 }
 0x444   :  { %v2996_v45 = vpop.f32.mrb[20].mxu0  ;;  %3000 = vmatprep.subr.bf16.mxu1 %v769_v43 }
 0x445   :  { %v719_v47 = vadd.f32 %v2996_v45, %v634_v13  ;;  %v710_v37 = vpop.f32.mrb[21].mxu0 }
 0x446   :  { %v711_v48 = vadd.f32 %v710_v37, %v634_v13  ;;  %v2997_v49 = vpop.f32.mrb[22].mxu0 }
 0x447   :  { %v731_v40 = vmax.f32 %v719_v47, 0.0  ;;  %v722_v50 = vadd.f32 %v2997_v49, %v634_v13  ;;  %v713_v51 = vpop.f32.mrb[23].mxu0  ;;  %3001 = vmatpush3.bf16.msra.mxu1 %v769_v43 }
 0x448   :  { %v729_v52 = vmax.f32 %v711_v48, 0.0  ;;  %v714_v53 = vadd.f32 %v713_v51, %v634_v13 }
 0x449   :  { %v743_v54 = vmul.f32 %v736_v42, %v731_v40  ;;  %v732_v55 = vmax.f32 %v722_v50, 0.0 }
 0x44a   :  { %v741_v57 = vmul.f32 %v736_v42, %v729_v52  ;;  %v730_v58 = vmax.f32 %v714_v53, 0.0 }
 0x44b   :  { %v744_v59 = vmul.f32 %v736_v42, %v732_v55  ;;  %v755_v61 = vadd.f32 %v748_v28, %v743_v54 }
 0x44c   :  { %v742_v60 = vmul.f32 %v736_v42, %v730_v58  ;;  %v753_v63 = vadd.f32 %v748_v28, %v741_v57  ;;  %v949_v57 = vrot.slane %v2676_v22, %v3381_v35 }
 0x44d   :  { %v756_v62 = vadd.f32 %v748_v28, %v744_v59 }
 0x44e   :  { %v754_v0 = vadd.f32 %v748_v28, %v742_v60  ;;  %v1050_v60 = vrot.slane %v2676_v22, %v3604_v14 }
 0x44f   :  { %v771_v1 = vpack.c.bf16 %v756_v62, %v755_v61 }
 0x450   :  { %v770_v3 = vpack.c.bf16 %v754_v0, %v753_v63 }
 0x452   :  { %3002 = vmatprep.subr.bf16.mxu1 %v770_v3 }
 0x453   :  { %3003 = vmatpush3.bf16.msra.mxu1 %v770_v3 }
 0x454   :  { %3004 = vmatprep.subr.bf16.mxu1 %v771_v1 }
 0x457   :  { %3005 = vmatpush3.bf16.msra.mxu1 %v771_v1 }
 0x458   :  { %3026 = vmatprep.subr.bf16.mxu1 %v3186_v4 }
 0x45a   :  { %3007 = vmatmul.mubr.msk.bf16.vlgmr.msra.gmra.mrb[16].mxu1 %vm420_vm10, %v3539_v56 }
 0x45b   :  { %3010 = vmatprep.mubr.msk.bf16.mxu1 %vm420_vm10, %v3553_v7  ;;  %3027 = vmatpush3.bf16.msra.mxu1 %v3186_v4 }
 0x45c   :  { %3028 = vmatprep.subr.bf16.mxu1 %v3187_v21 }
 0x45f   :  { %3029 = vmatpush3.bf16.msra.mxu1 %v3187_v21 }
 0x462   :  { %3011 = vmatmul.mubr.msk.bf16.gmra.mrb[20].mxu1 %vm420_vm10, %v3567_v19 }
 0x52d   :  { %v3008_v5 = vpop.f32.mrb[16].mxu1 }
 0x52e   :  { %v806_v8 = vpop.f32.mrb[17].mxu1 }
 0x52f   :  { %v3009_v9 = vpop.f32.mrb[18].mxu1 }
 0x530   :  { %v838_v10 = vpack.c.bf16 %v3009_v9, %v3008_v5  ;;  %v809_v11 = vpop.f32.mrb[19].mxu1  ;;  %v1062_v9 = vrot.slane %v2676_v22, %v3608_v16 }
 0x531   :  { %v837_v12 = vpack.c.bf16 %v809_v11, %v806_v8 }
 0x533   :  { %3018 = vmatprep.mubr.msk.bf16.mxu0 %vm647_vm1, %v837_v12 }
 0x534   :  { %3019 = vmatmul.mubr.msk.bf16.vlgmr.msra.gmra.mrb[24].mxu0 %vm647_vm1, %v838_v10 }
 0x535   :  { %v3012_v13 = vpop.f32.mrb[20].mxu1 }
 0x536   :  { %v822_v15 = vpop.f32.mrb[21].mxu1 }
 0x537   :  { %v3013_v18 = vpop.f32.mrb[22].mxu1 }
 0x538   :  { %v840_v42 = vpack.c.bf16 %v3013_v18, %v3012_v13  ;;  %v825_v17 = vpop.f32.mrb[23].mxu1 }
 0x539   :  { %v839_v20 = vpack.c.bf16 %v825_v17, %v822_v15 }
 0x53b   :  { %3022 = vmatprep.mubr.msk.bf16.mxu0 %vm647_vm1, %v839_v20 }
 0x53c   :  { %3023 = vmatmul.mubr.msk.bf16.gmra.mrb[28].mxu0 %vm647_vm1, %v840_v42 }
 0x53d   :  { %3046 = vmatprep.mubr.msk.bf16.mxu0 %vm420_vm10, %v3531_v46 }
 0x607   :  { %v3020_v24 = vpop.f32.mrb[24].mxu0 }
 0x608   :  { %v912_v25 = vadd.f32 %v3020_v24, %v844_v23  ;;  %v903_v26 = vpop.f32.mrb[25].mxu0 }
 0x609   :  { %v904_v27 = vadd.f32 %v903_v26, %v844_v23  ;;  %v3021_v28 = vpop.f32.mrb[26].mxu0 }
 0x60a   :  { %v915_v29 = vadd.f32 %v3021_v28, %v844_v23  ;;  %v906_v30 = vpop.f32.mrb[27].mxu0  ;;  %v936_v32 = vmax.f32 %v912_v25, 0.0 }
 0x60b   :  { %v907_v31 = vadd.f32 %v906_v30, %v844_v23  ;;  %v934_v36 = vmax.f32 %v904_v27, 0.0 }
 0x60c   :  { %v937_v33 = vmax.f32 %v915_v29, 0.0 }
 0x60d   :  { %v935_v38 = vmax.f32 %v907_v31, 0.0 }
 0x60e   :  { %v943_v39 = vpack.c.bf16 %v937_v33, %v936_v32 }
 0x60f   :  { %v942_v41 = vpack.c.bf16 %v935_v38, %v934_v36  ;;  %v3024_v43 = vpop.f32.mrb[28].mxu0 }
 0x610   :  { %v928_v44 = vadd.f32 %v3024_v43, %v844_v23  ;;  %v919_v45 = vpop.f32.mrb[29].mxu0 }
 0x611   :  { %v920_v47 = vadd.f32 %v919_v45, %v844_v23  ;;  %v3025_v37 = vpop.f32.mrb[30].mxu0  ;;  %3030 = vmatprep.mubr.msk.bf16.mxu1 %vm647_vm1, %v942_v41 }
 0x612   :  { %v931_v48 = vadd.f32 %v3025_v37, %v844_v23  ;;  %v922_v49 = vpop.f32.mrb[31].mxu0  ;;  %3031 = vmatmul.mubr.msk.bf16.vlgmr.msra.gmra.mrb[24].mxu1 %vm647_vm1, %v943_v39  ;;  %v940_v50 = vmax.f32 %v928_v44, 0.0 }
 0x613   :  { %v923_v40 = vadd.f32 %v922_v49, %v844_v23  ;;  %v938_v52 = vmax.f32 %v920_v47, 0.0 }
 0x614   :  { %v941_v51 = vmax.f32 %v931_v48, 0.0 }
 0x615   :  { %v939_v53 = vmax.f32 %v923_v40, 0.0  ;;  %v3188_v40 = vld [vmem:[%s3946_s4 + $0x10] sm:$0xff]  }
 0x616   :  { %v945_v54 = vpack.c.bf16 %v941_v51, %v940_v50  ;;  %v3189_v50 = vld [vmem:[%s3946_s4 + $0x18] sm:$0xff]  }
 0x617   :  { %v944_v55 = vpack.c.bf16 %v939_v53, %v938_v52 }
 0x619   :  { %3034 = vmatprep.mubr.msk.bf16.mxu1 %vm647_vm1, %v944_v55 }
 0x61a   :  { %3035 = vmatmul.mubr.msk.bf16.gmra.mrb[28].mxu1 %vm647_vm1, %v945_v54 }
 0x61b   :  { %3050 = vmatprep.mubr.msk.bf16.mxu1 %vm420_vm10, %v3553_v7 }
 0x6e5   :  { %v3032_v58 = vpop.f32.mrb[24].mxu1 }
 0x6e6   :  { %v1017_v59 = vadd.f32 %v3032_v58, %v949_v57  ;;  %v1008_v61 = vpop.f32.mrb[25].mxu1 }
 0x6e7   :  { %v1009_v62 = vadd.f32 %v1008_v61, %v949_v57  ;;  %v3033_v63 = vpop.f32.mrb[26].mxu1 }
 0x6e8   :  { %v1041_v0 = vmax.f32 %v1017_v59, 0.0  ;;  %v1020_v1 = vadd.f32 %v3033_v63, %v949_v57  ;;  %v1011_v3 = vpop.f32.mrb[27].mxu1 }
 0x6e9   :  { %v1039_v4 = vmax.f32 %v1009_v62, 0.0  ;;  %v1012_v5 = vadd.f32 %v1011_v3, %v949_v57  ;;  %v2701_v3 = vld [vmem:[%s3948_s6 + $0x8] sm:$0xf] }
 0x6ea   :  { %v1053_v8 = vmul.f32 %v1050_v60, %v1041_v0  ;;  %v1042_v10 = vmax.f32 %v1020_v1, 0.0  ;;  %v3190_v0 = vld [vmem:[%s3947_s5 + $0x20] sm:$0xff]   ;;  %v3191_v1 = vld [vmem:[%s3947_s5 + $0x28] sm:$0xff]  }
 0x6eb   :  { %v1051_v11 = vmul.f32 %v1050_v60, %v1039_v4  ;;  %v1040_v12 = vmax.f32 %v1012_v5, 0.0  ;;  %v1159_v4 = vrot.slane %v2701_v3, %v3442_v6 }
 0x6ec   :  { %v1054_v13 = vmul.f32 %v1050_v60, %v1042_v10  ;;  %v1065_v42 = vadd.f32 %v1062_v9, %v1053_v8 }
 0x6ed   :  { %v1052_v15 = vmul.f32 %v1050_v60, %v1040_v12  ;;  %v3036_v18 = vpop.f32.mrb[28].mxu1  ;;  %v1063_v23 = vadd.f32 %v1062_v9, %v1051_v11 }
 0x6ee   :  { %v1066_v17 = vadd.f32 %v1062_v9, %v1054_v13  ;;  %v1033_v20 = vadd.f32 %v3036_v18, %v949_v57  ;;  %v1024_v21 = vpop.f32.mrb[29].mxu1 }
 0x6ef   :  { %v1064_v24 = vadd.f32 %v1062_v9, %v1052_v15  ;;  %v1025_v25 = vadd.f32 %v1024_v21, %v949_v57  ;;  %v3037_v26 = vpop.f32.mrb[30].mxu1 }
 0x6f0   :  { %v1084_v27 = vpack.c.bf16 %v1066_v17, %v1065_v42  ;;  %v1045_v28 = vmax.f32 %v1033_v20, 0.0  ;;  %v1036_v29 = vadd.f32 %v3037_v26, %v949_v57  ;;  %v1027_v30 = vpop.f32.mrb[31].mxu1 }
 0x6f1   :  { %v1083_v31 = vpack.c.bf16 %v1064_v24, %v1063_v23  ;;  %v1043_v22 = vmax.f32 %v1025_v25, 0.0  ;;  %v1028_v32 = vadd.f32 %v1027_v30, %v949_v57 }
 0x6f2   :  { %v1057_v33 = vmul.f32 %v1050_v60, %v1045_v28  ;;  %v1046_v36 = vmax.f32 %v1036_v29, 0.0 }
 0x6f3   :  { %v1055_v38 = vmul.f32 %v1050_v60, %v1043_v22  ;;  %v1044_v39 = vmax.f32 %v1028_v32, 0.0  ;;  %3038 = vmatprep.subr.bf16.mxu0 %v1083_v31  ;;  %3158 = vmatprep.subr.bf16.mxu1 %v1083_v31 }
 0x6f4   :  { %v1058_v41 = vmul.f32 %v1050_v60, %v1046_v36  ;;  %3039 = vmatpush3.bf16.msra.mxu0 %v1083_v31  ;;  %3162 = vmatpush3.bf16.msra.mxu1 %v1083_v31  ;;  %v1069_v44 = vadd.f32 %v1062_v9, %v1057_v33 }
 0x6f5   :  { %v1056_v43 = vmul.f32 %v1050_v60, %v1044_v39  ;;  %3040 = vmatprep.subr.bf16.mxu0 %v1084_v27  ;;  %3159 = vmatprep.subr.bf16.mxu1 %v1084_v27  ;;  %v1067_v47 = vadd.f32 %v1062_v9, %v1055_v38 }
 0x6f6   :  { %v1070_v45 = vadd.f32 %v1062_v9, %v1058_v41  ;;  %v3192_v41 = vld [vmem:[%s3946_s4 + $0x20] sm:$0xff]  }
 0x6f7   :  { %v1068_v37 = vadd.f32 %v1062_v9, %v1056_v43  ;;  %v3193_v43 = vld [vmem:[%s3946_s4 + $0x28] sm:$0xff]  }
 0x6f8   :  { %v1086_v48 = vpack.c.bf16 %v1070_v45, %v1069_v44  ;;  %3041 = vmatpush3.bf16.msra.mxu0 %v1084_v27  ;;  %3163 = vmatpush3.bf16.msra.mxu1 %v1084_v27  ;;  %v1264_v44 = vrot.slane %v2701_v3, %v3381_v35 }
 0x6f9   :  { %v1085_v49 = vpack.c.bf16 %v1068_v37, %v1067_v47  ;;  %v1365_v37 = vrot.slane %v2701_v3, %v3604_v14 }
 0x6fb   :  { %3042 = vmatprep.subr.bf16.mxu0 %v1085_v49  ;;  %3160 = vmatprep.subr.bf16.mxu1 %v1085_v49 }
 0x6fc   :  { %3043 = vmatpush3.bf16.msra.mxu0 %v1085_v49  ;;  %3164 = vmatpush3.bf16.msra.mxu1 %v1085_v49 }
 0x6fd   :  { %3044 = vmatprep.subr.bf16.mxu0 %v1086_v48  ;;  %3161 = vmatprep.subr.bf16.mxu1 %v1086_v48 }
 0x700   :  { %3045 = vmatpush3.bf16.msra.mxu0 %v1086_v48  ;;  %3165 = vmatpush3.bf16.msra.mxu1 %v1086_v48 }
 0x701   :  { %3054 = vmatprep.subr.bf16.mxu1 %v3188_v40  ;;  %3066 = vmatprep.subr.bf16.mxu0 %v3190_v0 }
 0x703   :  { %3047 = vmatmul.mubr.msk.bf16.vlgmr.msra.gmra.mrb[32].mxu0 %vm420_vm10, %v3539_v56  ;;  %3051 = vmatmul.mubr.msk.bf16.vlgmr.msra.gmra.mrb[32].mxu1 %vm420_vm10, %v3567_v19 }
 0x704   :  { %3055 = vmatpush3.bf16.msra.mxu1 %v3188_v40  ;;  %3067 = vmatpush3.bf16.msra.mxu0 %v3190_v0 }
 0x705   :  { %3056 = vmatprep.subr.bf16.mxu1 %v3189_v50  ;;  %3068 = vmatprep.subr.bf16.mxu0 %v3191_v1 }
 0x708   :  { %3057 = vmatpush3.bf16.msra.mxu1 %v3189_v50  ;;  %3069 = vmatpush3.bf16.msra.mxu0 %v3191_v1 }
 0x709   :  { %3094 = vmatprep.subr.bf16.mxu0 %v3192_v41 }
 0x7d6   :  { %v3048_v51 = vpop.f32.mrb[32].mxu0  ;;  %v3052_v52 = vpop.f32.mrb[32].mxu1 }
 0x7d7   :  { %v1121_v53 = vpop.f32.mrb[33].mxu0  ;;  %v1137_v54 = vpop.f32.mrb[33].mxu1 }
 0x7d8   :  { %v3049_v55 = vpop.f32.mrb[34].mxu0  ;;  %v3053_v57 = vpop.f32.mrb[34].mxu1 }
 0x7d9   :  { %v1153_v58 = vpack.c.bf16 %v3049_v55, %v3048_v51  ;;  %v1155_v59 = vpack.c.bf16 %v3053_v57, %v3052_v52  ;;  %v1124_v60 = vpop.f32.mrb[35].mxu0  ;;  %v1140_v61 = vpop.f32.mrb[35].mxu1  ;;  %v1377_v57 = vrot.slane %v2701_v3, %v3608_v16 }
 0x7da   :  { %v1152_v62 = vpack.c.bf16 %v1124_v60, %v1121_v53  ;;  %v1154_v63 = vpack.c.bf16 %v1140_v61, %v1137_v54 }
 0x7dc   :  { %3058 = vmatprep.mubr.msk.bf16.mxu1 %vm647_vm1, %v1152_v62 }
 0x7dd   :  { %3059 = vmatmul.mubr.msk.bf16.vlgmr.msra.gmra.mrb[36].mxu1 %vm647_vm1, %v1153_v58 }
 0x7de   :  { %3062 = vmatprep.mubr.msk.bf16.mxu1 %vm647_vm1, %v1154_v63 }
 0x7e5   :  { %3063 = vmatmul.mubr.msk.bf16.gmra.mrb[40].mxu1 %vm647_vm1, %v1155_v59 }
 0x7e6   :  { %3086 = vmatprep.mubr.msk.bf16.mxu1 %vm420_vm10, %v3531_v46 }
 0x8b0   :  { %v3060_v5 = vpop.f32.mrb[36].mxu1 }
 0x8b1   :  { %v1227_v8 = vadd.f32 %v3060_v5, %v1159_v4  ;;  %v1218_v9 = vpop.f32.mrb[37].mxu1 }
 0x8b2   :  { %v1219_v10 = vadd.f32 %v1218_v9, %v1159_v4  ;;  %v3061_v11 = vpop.f32.mrb[38].mxu1 }
 0x8b3   :  { %v1230_v12 = vadd.f32 %v3061_v11, %v1159_v4  ;;  %v1221_v13 = vpop.f32.mrb[39].mxu1  ;;  %v1251_v18 = vmax.f32 %v1227_v8, 0.0 }
 0x8b4   :  { %v1222_v15 = vadd.f32 %v1221_v13, %v1159_v4  ;;  %v1249_v17 = vmax.f32 %v1219_v10, 0.0 }
 0x8b5   :  { %v1252_v42 = vmax.f32 %v1230_v12, 0.0 }
 0x8b6   :  { %v1250_v20 = vmax.f32 %v1222_v15, 0.0 }
 0x8b7   :  { %v1258_v21 = vpack.c.bf16 %v1252_v42, %v1251_v18 }
 0x8b8   :  { %v1257_v23 = vpack.c.bf16 %v1250_v20, %v1249_v17  ;;  %v3064_v24 = vpop.f32.mrb[40].mxu1 }
 0x8b9   :  { %v1243_v25 = vadd.f32 %v3064_v24, %v1159_v4  ;;  %v1234_v26 = vpop.f32.mrb[41].mxu1 }
 0x8ba   :  { %v1235_v27 = vadd.f32 %v1234_v26, %v1159_v4  ;;  %v3065_v28 = vpop.f32.mrb[42].mxu1  ;;  %3070 = vmatprep.mubr.msk.bf16.mxu0 %vm647_vm1, %v1257_v23 }
 0x8bb   :  { %v1246_v29 = vadd.f32 %v3065_v28, %v1159_v4  ;;  %v1237_v30 = vpop.f32.mrb[43].mxu1  ;;  %3071 = vmatmul.mubr.msk.bf16.vlgmr.msra.gmra.mrb[36].mxu0 %vm647_vm1, %v1258_v21  ;;  %v1255_v22 = vmax.f32 %v1243_v25, 0.0 }
 0x8bc   :  { %v1238_v31 = vadd.f32 %v1237_v30, %v1159_v4  ;;  %v1253_v33 = vmax.f32 %v1235_v27, 0.0  ;;  %3095 = vmatpush3.bf16.msra.mxu0 %v3192_v41 }
 0x8bd   :  { %v1256_v32 = vmax.f32 %v1246_v29, 0.0  ;;  %3096 = vmatprep.subr.bf16.mxu0 %v3193_v43 }
 0x8be   :  { %v1254_v36 = vmax.f32 %v1238_v31, 0.0 }
 0x8bf   :  { %v1260_v38 = vpack.c.bf16 %v1256_v32, %v1255_v22  ;;  %v3194_v32 = vld [vmem:[%s3947_s5 + $0x30] sm:$0xff]  }
 0x8c0   :  { %v1259_v39 = vpack.c.bf16 %v1254_v36, %v1253_v33  ;;  %3097 = vmatpush3.bf16.msra.mxu0 %v3193_v43 }
 0x8c2   :  { %3074 = vmatprep.mubr.msk.bf16.mxu0 %vm647_vm1, %v1259_v39 }
 0x8c3   :  { %3075 = vmatmul.mubr.msk.bf16.gmra.mrb[40].mxu0 %vm647_vm1, %v1260_v38 }
 0x98e   :  { %v3072_v45 = vpop.f32.mrb[36].mxu0 }
 0x98f   :  { %v1332_v47 = vadd.f32 %v3072_v45, %v1264_v44  ;;  %v1323_v48 = vpop.f32.mrb[37].mxu0 }
 0x990   :  { %v1324_v49 = vadd.f32 %v1323_v48, %v1264_v44  ;;  %v3073_v40 = vpop.f32.mrb[38].mxu0 }
 0x991   :  { %v1356_v50 = vmax.f32 %v1332_v47, 0.0  ;;  %v1335_v51 = vadd.f32 %v3073_v40, %v1264_v44  ;;  %v1326_v52 = vpop.f32.mrb[39].mxu0  ;;  %v3195_v40 = vld [vmem:[%s3947_s5 + $0x38] sm:$0xff]  }
 0x992   :  { %v1354_v53 = vmax.f32 %v1324_v49, 0.0  ;;  %v1327_v54 = vadd.f32 %v1326_v52, %v1264_v44 }
 0x993   :  { %v1368_v55 = vmul.f32 %v1365_v37, %v1356_v50  ;;  %v1357_v58 = vmax.f32 %v1335_v51, 0.0  ;;  %v2726_v50 = vld [vmem:[%s3948_s6 + $0xc] sm:$0xf] }
 0x994   :  { %v1366_v59 = vmul.f32 %v1365_v37, %v1354_v53  ;;  %v1355_v60 = vmax.f32 %v1327_v54, 0.0  ;;  %v1474_v51 = vrot.slane %v2726_v50, %v3442_v6 }
 0x995   :  { %v1369_v61 = vmul.f32 %v1365_v37, %v1357_v58  ;;  %v1380_v0 = vadd.f32 %v1377_v57, %v1368_v55 }
 0x996   :  { %v1367_v62 = vmul.f32 %v1365_v37, %v1355_v60  ;;  %v3076_v63 = vpop.f32.mrb[40].mxu0  ;;  %v1378_v8 = vadd.f32 %v1377_v57, %v1366_v59 }
 0x997   :  { %v1381_v1 = vadd.f32 %v1377_v57, %v1369_v61  ;;  %v1348_v4 = vadd.f32 %v3076_v63, %v1264_v44  ;;  %v1339_v5 = vpop.f32.mrb[41].mxu0 }
 0x998   :  { %v1379_v9 = vadd.f32 %v1377_v57, %v1367_v62  ;;  %v1340_v10 = vadd.f32 %v1339_v5, %v1264_v44  ;;  %v3077_v11 = vpop.f32.mrb[42].mxu0 }
 0x999   :  { %v1360_v12 = vmax.f32 %v1348_v4, 0.0  ;;  %v1351_v13 = vadd.f32 %v3077_v11, %v1264_v44  ;;  %v1342_v15 = vpop.f32.mrb[43].mxu0  ;;  %v1399_v18 = vpack.c.bf16 %v1381_v1, %v1380_v0 }
 0x99a   :  { %v1358_v42 = vmax.f32 %v1340_v10, 0.0  ;;  %v1343_v3 = vadd.f32 %v1342_v15, %v1264_v44  ;;  %v1398_v17 = vpack.c.bf16 %v1379_v9, %v1378_v8 }
 0x99b   :  { %v1372_v20 = vmul.f32 %v1365_v37, %v1360_v12  ;;  %v1361_v21 = vmax.f32 %v1351_v13, 0.0 }
 0x99c   :  { %v1370_v23 = vmul.f32 %v1365_v37, %v1358_v42  ;;  %v1359_v24 = vmax.f32 %v1343_v3, 0.0  ;;  %3078 = vmatprep.subr.bf16.mxu1 %v1398_v17 }
 0x99d   :  { %v1373_v25 = vmul.f32 %v1365_v37, %v1361_v21  ;;  %3079 = vmatpush3.bf16.msra.mxu1 %v1398_v17  ;;  %v1384_v27 = vadd.f32 %v1377_v57, %v1372_v20  ;;  %v3196_v21 = vld [vmem:[%s3946_s4 + $0x30] sm:$0xff]  }
 0x99e   :  { %v1371_v26 = vmul.f32 %v1365_v37, %v1359_v24  ;;  %3080 = vmatprep.subr.bf16.mxu1 %v1399_v18  ;;  %v1382_v29 = vadd.f32 %v1377_v57, %v1370_v23  ;;  %v3197_v23 = vld [vmem:[%s3946_s4 + $0x38] sm:$0xff]   ;;  %v1579_v24 = vrot.slane %v2726_v50, %v3381_v35 }
 0x99f   :  { %v1385_v28 = vadd.f32 %v1377_v57, %v1373_v25 }
 0x9a0   :  { %v1383_v30 = vadd.f32 %v1377_v57, %v1371_v26 }
 0x9a1   :  { %3081 = vmatpush3.bf16.msra.mxu1 %v1399_v18  ;;  %v1401_v31 = vpack.c.bf16 %v1385_v28, %v1384_v27  ;;  %v1680_v27 = vrot.slane %v2726_v50, %v3604_v14 }
 0x9a2   :  { %v1400_v22 = vpack.c.bf16 %v1383_v30, %v1382_v29 }
 0x9a4   :  { %3082 = vmatprep.subr.bf16.mxu1 %v1400_v22 }
 0x9a5   :  { %3083 = vmatpush3.bf16.msra.mxu1 %v1400_v22 }
 0x9a6   :  { %3084 = vmatprep.subr.bf16.mxu1 %v1401_v31 }
 0x9a9   :  { %3085 = vmatpush3.bf16.msra.mxu1 %v1401_v31 }
 0x9aa   :  { %3106 = vmatprep.subr.bf16.mxu1 %v3194_v32 }
 0x9ac   :  { %3087 = vmatmul.mubr.msk.bf16.vlgmr.msra.gmra.mrb[44].mxu1 %vm420_vm10, %v3539_v56 }
 0x9ad   :  { %3090 = vmatprep.mubr.msk.bf16.mxu1 %vm420_vm10, %v3553_v7  ;;  %3107 = vmatpush3.bf16.msra.mxu1 %v3194_v32 }
 0x9ae   :  { %3108 = vmatprep.subr.bf16.mxu1 %v3195_v40 }
 0x9b1   :  { %3109 = vmatpush3.bf16.msra.mxu1 %v3195_v40 }
 0x9b2   :  { %3134 = vmatprep.subr.bf16.mxu1 %v3196_v21 }
 0x9b4   :  { %3091 = vmatmul.mubr.msk.bf16.gmra.mrb[48].mxu1 %vm420_vm10, %v3567_v19 }
 0xa7f   :  { %v3088_v33 = vpop.f32.mrb[44].mxu1 }
 0xa80   :  { %v1436_v36 = vpop.f32.mrb[45].mxu1 }
 0xa81   :  { %v3089_v38 = vpop.f32.mrb[46].mxu1 }
 0xa82   :  { %v1468_v39 = vpack.c.bf16 %v3089_v38, %v3088_v33  ;;  %v1439_v41 = vpop.f32.mrb[47].mxu1 }
 0xa83   :  { %v1467_v43 = vpack.c.bf16 %v1439_v41, %v1436_v36 }
 0xa85   :  { %3098 = vmatprep.mubr.msk.bf16.mxu0 %vm647_vm1, %v1467_v43 }
 0xa86   :  { %3099 = vmatmul.mubr.msk.bf16.vlgmr.msra.gmra.mrb[44].mxu0 %vm647_vm1, %v1468_v39  ;;  %v1692_v39 = vrot.slane %v2726_v50, %v3608_v16 }
 0xa87   :  { %v3092_v44 = vpop.f32.mrb[48].mxu1 }
 0xa88   :  { %v1452_v45 = vpop.f32.mrb[49].mxu1 }
 0xa89   :  { %v3093_v47 = vpop.f32.mrb[50].mxu1 }
 0xa8a   :  { %v1470_v37 = vpack.c.bf16 %v3093_v47, %v3092_v44  ;;  %v1455_v48 = vpop.f32.mrb[51].mxu1 }
 0xa8b   :  { %v1469_v49 = vpack.c.bf16 %v1455_v48, %v1452_v45 }
 0xa8d   :  { %3102 = vmatprep.mubr.msk.bf16.mxu0 %vm647_vm1, %v1469_v49 }
 0xa8e   :  { %3103 = vmatmul.mubr.msk.bf16.gmra.mrb[48].mxu0 %vm647_vm1, %v1470_v37 }
 0xa8f   :  { %3126 = vmatprep.mubr.msk.bf16.mxu0 %vm420_vm10, %v3531_v46 }
 0xb59   :  { %v3100_v52 = vpop.f32.mrb[44].mxu0 }
 0xb5a   :  { %v1542_v53 = vadd.f32 %v3100_v52, %v1474_v51  ;;  %v1533_v54 = vpop.f32.mrb[45].mxu0 }
 0xb5b   :  { %v1534_v55 = vadd.f32 %v1533_v54, %v1474_v51  ;;  %v3101_v57 = vpop.f32.mrb[46].mxu0 }
 0xb5c   :  { %v1545_v58 = vadd.f32 %v3101_v57, %v1474_v51  ;;  %v1536_v59 = vpop.f32.mrb[47].mxu0  ;;  %v1566_v60 = vmax.f32 %v1542_v53, 0.0 }
 0xb5d   :  { %v1537_v46 = vadd.f32 %v1536_v59, %v1474_v51  ;;  %v1564_v62 = vmax.f32 %v1534_v55, 0.0 }
 0xb5e   :  { %v1567_v61 = vmax.f32 %v1545_v58, 0.0 }
 0xb5f   :  { %v1565_v63 = vmax.f32 %v1537_v46, 0.0 }
 0xb60   :  { %v1573_v0 = vpack.c.bf16 %v1567_v61, %v1566_v60 }
 0xb61   :  { %v1572_v1 = vpack.c.bf16 %v1565_v63, %v1564_v62  ;;  %v3104_v4 = vpop.f32.mrb[48].mxu0 }
 0xb62   :  { %v1558_v5 = vadd.f32 %v3104_v4, %v1474_v51  ;;  %v1549_v8 = vpop.f32.mrb[49].mxu0 }
 0xb63   :  { %v1550_v9 = vadd.f32 %v1549_v8, %v1474_v51  ;;  %v3105_v10 = vpop.f32.mrb[50].mxu0  ;;  %3110 = vmatprep.mubr.msk.bf16.mxu1 %vm647_vm1, %v1572_v1 }
 0xb64   :  { %v1561_v11 = vadd.f32 %v3105_v10, %v1474_v51  ;;  %v1552_v12 = vpop.f32.mrb[51].mxu0  ;;  %3111 = vmatmul.mubr.msk.bf16.vlgmr.msra.gmra.mrb[52].mxu1 %vm647_vm1, %v1573_v0  ;;  %v1570_v15 = vmax.f32 %v1558_v5, 0.0 }
 0xb65   :  { %v1553_v13 = vadd.f32 %v1552_v12, %v1474_v51  ;;  %v1568_v42 = vmax.f32 %v1550_v9, 0.0  ;;  %3135 = vmatpush3.bf16.msra.mxu1 %v3196_v21 }
 0xb66   :  { %v1571_v18 = vmax.f32 %v1561_v11, 0.0  ;;  %3136 = vmatprep.subr.bf16.mxu1 %v3197_v23 }
 0xb67   :  { %v1569_v3 = vmax.f32 %v1553_v13, 0.0 }
 0xb68   :  { %v1575_v17 = vpack.c.bf16 %v1571_v18, %v1570_v15  ;;  %v3198_v15 = vld [vmem:[%s3947_s5 + $0x40] sm:$0xff]  }
 0xb69   :  { %v1574_v20 = vpack.c.bf16 %v1569_v3, %v1568_v42  ;;  %3137 = vmatpush3.bf16.msra.mxu1 %v3197_v23 }
 0xb6b   :  { %3114 = vmatprep.mubr.msk.bf16.mxu1 %vm647_vm1, %v1574_v20 }
 0xb6c   :  { %3115 = vmatmul.mubr.msk.bf16.gmra.mrb[56].mxu1 %vm647_vm1, %v1575_v17 }
 0xc37   :  { %v3112_v25 = vpop.f32.mrb[52].mxu1 }
 0xc38   :  { %v1647_v26 = vadd.f32 %v3112_v25, %v1579_v24  ;;  %v1638_v28 = vpop.f32.mrb[53].mxu1 }
 0xc39   :  { %v1639_v29 = vadd.f32 %v1638_v28, %v1579_v24  ;;  %v3113_v30 = vpop.f32.mrb[54].mxu1  ;;  %v2024_v28 = vld [vmem:[%s3949_s7 + $0x20] sm:$0xff] }
 0xc3a   :  { %v1671_v31 = vmax.f32 %v1647_v26, 0.0  ;;  %v1650_v22 = vadd.f32 %v3113_v30, %v1579_v24  ;;  %v1641_v32 = vpop.f32.mrb[55].mxu1  ;;  %v3199_v26 = vld [vmem:[%s3947_s5 + $0x48] sm:$0xff]  }
 0xc3b   :  { %v1669_v33 = vmax.f32 %v1639_v29, 0.0  ;;  %v1642_v36 = vadd.f32 %v1641_v32, %v1579_v24  ;;  %v2021_v29 = vld [vmem:[%s3949_s7 + $0x8] sm:$0xff] }
 0xc3c   :  { %v1683_v38 = vmul.f32 %v1680_v27, %v1671_v31  ;;  %v1672_v41 = vmax.f32 %v1650_v22, 0.0  ;;  %v2025_v22 = vld [vmem:[%s3949_s7 + $0x28] sm:$0xff] }
 0xc3d   :  { %v1681_v43 = vmul.f32 %v1680_v27, %v1669_v33  ;;  %v1670_v44 = vmax.f32 %v1642_v36, 0.0  ;;  %v2770_v32 = vcombine.low %v2021_v29, %v2025_v22  ;;  %v2771_v33 = vcombine.high %v2021_v29, %v2025_v22  ;;  %v3748_v36 = vld [vmem:[%s3948_s6 + $0x10] sm:$0xf] }
 0xc3e   :  { %v1684_v45 = vmul.f32 %v1680_v27, %v1672_v41  ;;  %v1695_v48 = vadd.f32 %v1692_v39, %v1683_v38  ;;  %v1789_v38 = vrot.slane %v3748_v36, %v3442_v6 }
 0xc3f   :  { %v1682_v47 = vmul.f32 %v1680_v27, %v1670_v44  ;;  %v3116_v37 = vpop.f32.mrb[56].mxu1  ;;  %v1693_v52 = vadd.f32 %v1692_v39, %v1681_v43 }
 0xc40   :  { %v1696_v49 = vadd.f32 %v1692_v39, %v1684_v45  ;;  %v1663_v40 = vadd.f32 %v3116_v37, %v1579_v24  ;;  %v1654_v51 = vpop.f32.mrb[57].mxu1 }
 0xc41   :  { %v1694_v53 = vadd.f32 %v1692_v39, %v1682_v47  ;;  %v1655_v54 = vadd.f32 %v1654_v51, %v1579_v24  ;;  %v3117_v55 = vpop.f32.mrb[58].mxu1 }
 0xc42   :  { %v1675_v57 = vmax.f32 %v1663_v40, 0.0  ;;  %v1666_v58 = vadd.f32 %v3117_v55, %v1579_v24  ;;  %v1657_v59 = vpop.f32.mrb[59].mxu1  ;;  %v1714_v46 = vpack.c.bf16 %v1696_v49, %v1695_v48 }
 0xc43   :  { %v1673_v60 = vmax.f32 %v1655_v54, 0.0  ;;  %v1658_v50 = vadd.f32 %v1657_v59, %v1579_v24  ;;  %v1713_v61 = vpack.c.bf16 %v1694_v53, %v1693_v52 }
 0xc44   :  { %v1687_v62 = vmul.f32 %v1680_v27, %v1675_v57  ;;  %v1676_v63 = vmax.f32 %v1666_v58, 0.0 }
 0xc45   :  { %v1685_v0 = vmul.f32 %v1680_v27, %v1673_v60  ;;  %v1674_v1 = vmax.f32 %v1658_v50, 0.0  ;;  %3118 = vmatprep.subr.bf16.mxu0 %v1713_v61 }
 0xc46   :  { %v1688_v4 = vmul.f32 %v1680_v27, %v1676_v63  ;;  %3119 = vmatpush3.bf16.msra.mxu0 %v1713_v61  ;;  %v1699_v8 = vadd.f32 %v1692_v39, %v1687_v62 }
 0xc47   :  { %v1686_v5 = vmul.f32 %v1680_v27, %v1674_v1  ;;  %3120 = vmatprep.subr.bf16.mxu0 %v1714_v46  ;;  %v1697_v10 = vadd.f32 %v1692_v39, %v1685_v0  ;;  %v2020_v27 = vld [vmem:[%s3949_s7] sm:$0xff] }
 0xc48   :  { %v1700_v9 = vadd.f32 %v1692_v39, %v1688_v4  ;;  %v2768_v30 = vcombine.low %v2020_v27, %v2024_v28  ;;  %v2769_v31 = vcombine.high %v2020_v27, %v2024_v28 }
 0xc49   :  { %v1698_v11 = vadd.f32 %v1692_v39, %v1686_v5 }
 0xc4a   :  { %3121 = vmatpush3.bf16.msra.mxu0 %v1714_v46  ;;  %v1716_v12 = vpack.c.bf16 %v1700_v9, %v1699_v8  ;;  %2170 = vmatprep.subr.bf16.mxu1 %v2769_v31  ;;  %v2028_v8 = vld [vmem:[%s3949_s7 + $0x40] sm:$0xff] }
 0xc4b   :  { %v1715_v13 = vpack.c.bf16 %v1698_v11, %v1697_v10  ;;  %v2032_v9 = vld [vmem:[%s3949_s7 + $0x60] sm:$0xff]  ;;  %v2029_v10 = vld [vmem:[%s3949_s7 + $0x48] sm:$0xff] }
 0xc4c   :  { %v2777_v11 = vcombine.high %v2028_v8, %v2032_v9 }
 0xc4d   :  { %3122 = vmatprep.subr.bf16.mxu0 %v1715_v13 }
 0xc4e   :  { %3123 = vmatpush3.bf16.msra.mxu0 %v1715_v13  ;;  %v2776_v13 = vcombine.low %v2028_v8, %v2032_v9 }
 0xc4f   :  { %3124 = vmatprep.subr.bf16.mxu0 %v1716_v12 }
 0xc52   :  { %3125 = vmatpush3.bf16.msra.mxu0 %v1716_v12  ;;  %v2033_v12 = vld [vmem:[%s3949_s7 + $0x68] sm:$0xff] }
 0xc53   :  { %3146 = vmatprep.subr.bf16.mxu0 %v3198_v15 }
 0xc55   :  { %3127 = vmatmul.mubr.msk.bf16.vlgmr.msra.gmra.mrb[52].mxu0 %vm420_vm10, %v3539_v56 }
 0xc56   :  { %3130 = vmatprep.mubr.msk.bf16.mxu0 %vm420_vm10, %v3553_v7  ;;  %3147 = vmatpush3.bf16.msra.mxu0 %v3198_v15  ;;  %v2778_v15 = vcombine.low %v2029_v10, %v2033_v12 }
 0xc57   :  { %3148 = vmatprep.subr.bf16.mxu0 %v3199_v26 }
 0xc5a   :  { %3149 = vmatpush3.bf16.msra.mxu0 %v3199_v26  ;;  %v1995_v26 = vrot.slane %v3748_v36, %v3604_v14 }
 0xc5b   :  { %2243 = vmatprep.subr.bf16.mxu0 %v2771_v33 }
 0xc5d   :  { %3131 = vmatmul.mubr.msk.bf16.gmra.mrb[56].mxu0 %vm420_vm10, %v3567_v19 }
 0xd28   :  { %v3128_v18 = vpop.f32.mrb[52].mxu0 }
 0xd29   :  { %v1751_v42 = vpop.f32.mrb[53].mxu0 }
 0xd2a   :  { %v3129_v3 = vpop.f32.mrb[54].mxu0 }
 0xd2b   :  { %v1783_v17 = vpack.c.bf16 %v3129_v3, %v3128_v18  ;;  %v1754_v20 = vpop.f32.mrb[55].mxu0  ;;  %v2779_v18 = vcombine.high %v2029_v10, %v2033_v12  ;;  %v2026_v3 = vld [vmem:[%s3949_s7 + $0x30] sm:$0xff] }
 0xd2c   :  { %v1782_v21 = vpack.c.bf16 %v1754_v20, %v1751_v42  ;;  %v2022_v42 = vld [vmem:[%s3949_s7 + $0x10] sm:$0xff] }
 0xd2d   :  { %v2772_v20 = vcombine.low %v2022_v42, %v2026_v3 }
 0xd2e   :  { %3138 = vmatprep.mubr.msk.bf16.mxu1 %vm647_vm1, %v1782_v21  ;;  %v2773_v21 = vcombine.high %v2022_v42, %v2026_v3 }
 0xd2f   :  { %3139 = vmatmul.mubr.msk.bf16.vlgmr.msra.gmra.mrb[60].mxu1 %vm647_vm1, %v1783_v17  ;;  %v2023_v17 = vld [vmem:[%s3949_s7 + $0x18] sm:$0xff] }
 0xd30   :  { %v3132_v56 = vpop.f32.mrb[56].mxu0  ;;  %2171 = vmatpush1.bf16.msra.mxu1 %v2768_v30 }
 0xd31   :  { %v1767_v7 = vpop.f32.mrb[57].mxu0  ;;  %2172 = vmatprep.subr.bf16.mxu1 %v2777_v11 }
 0xd32   :  { %v3133_v23 = vpop.f32.mrb[58].mxu0 }
 0xd33   :  { %v1785_v19 = vpack.c.bf16 %v3133_v23, %v3132_v56  ;;  %v1770_v24 = vpop.f32.mrb[59].mxu0  ;;  %v2027_v56 = vld [vmem:[%s3949_s7 + $0x38] sm:$0xff] }
 0xd34   :  { %v1784_v25 = vpack.c.bf16 %v1770_v24, %v1767_v7  ;;  %2173 = vmatpush1.bf16.msra.mxu1 %v2776_v13  ;;  %v2774_v7 = vcombine.low %v2023_v17, %v2027_v56  ;;  %v2775_v23 = vcombine.high %v2023_v17, %v2027_v56 }
 0xd35   :  { %2316 = vmatprep.subr.bf16.mxu1 %v2773_v21 }
 0xd36   :  { %3142 = vmatprep.mubr.msk.bf16.mxu1 %vm647_vm1, %v1784_v25 }
 0xd37   :  { %3143 = vmatmul.mubr.msk.bf16.gmra.mrb[64].mxu1 %vm647_vm1, %v1785_v19  ;;  %v1894_v19 = vrot.slane %v3748_v36, %v3381_v35 }
 0xd38   :  { %2202 = vmatprep.mubr.bf16.mxu1 %v3224_v2 }
 0xe02   :  { %v3140_v39 = vpop.f32.mrb[60].mxu1 }
 0xe03   :  { %v1857_v41 = vadd.f32 %v3140_v39, %v1789_v38  ;;  %v1848_v43 = vpop.f32.mrb[61].mxu1  ;;  %v2007_v39 = vrot.slane %v3748_v36, %v3608_v16  ;;  %v2034_v36 = vld [vmem:[%s3949_s7 + $0x70] sm:$0xff] }
 0xe04   :  { %v1849_v44 = vadd.f32 %v1848_v43, %v1789_v38  ;;  %v3141_v45 = vpop.f32.mrb[62].mxu1 }
 0xe05   :  { %v1860_v47 = vadd.f32 %v3141_v45, %v1789_v38  ;;  %v1851_v37 = vpop.f32.mrb[63].mxu1  ;;  %v1881_v49 = vmax.f32 %v1857_v41, 0.0 }
 0xe06   :  { %v1852_v48 = vadd.f32 %v1851_v37, %v1789_v38  ;;  %v1879_v51 = vmax.f32 %v1849_v44, 0.0 }
 0xe07   :  { %v1882_v40 = vmax.f32 %v1860_v47, 0.0 }
 0xe08   :  { %v1880_v52 = vmax.f32 %v1852_v48, 0.0 }
 0xe09   :  { %v1888_v53 = vpack.c.bf16 %v1882_v40, %v1881_v49 }
 0xe0a   :  { %v1887_v54 = vpack.c.bf16 %v1880_v52, %v1879_v51  ;;  %v3144_v55 = vpop.f32.mrb[64].mxu1  ;;  %v2030_v52 = vld [vmem:[%s3949_s7 + $0x50] sm:$0xff] }
 0xe0b   :  { %v1873_v57 = vadd.f32 %v3144_v55, %v1789_v38  ;;  %v1864_v58 = vpop.f32.mrb[65].mxu1  ;;  %v2780_v12 = vcombine.low %v2030_v52, %v2034_v36 }
 0xe0c   :  { %v1865_v59 = vadd.f32 %v1864_v58, %v1789_v38  ;;  %v3145_v46 = vpop.f32.mrb[66].mxu1  ;;  %3150 = vmatprep.mubr.msk.bf16.mxu0 %vm647_vm1, %v1887_v54  ;;  %v2031_v58 = vld [vmem:[%s3949_s7 + $0x58] sm:$0xff] }
 0xe0d   :  { %v1876_v60 = vadd.f32 %v3145_v46, %v1789_v38  ;;  %v1867_v50 = vpop.f32.mrb[67].mxu1  ;;  %3151 = vmatmul.mubr.msk.bf16.vlgmr.msra.gmra.mrb[60].mxu0 %vm647_vm1, %v1888_v53  ;;  %v1885_v62 = vmax.f32 %v1873_v57, 0.0 }
 0xe0e   :  { %v1868_v61 = vadd.f32 %v1867_v50, %v1789_v38  ;;  %2244 = vmatpush1.bf16.msra.mxu0 %v2770_v32  ;;  %v1883_v0 = vmax.f32 %v1865_v59, 0.0  ;;  %v2035_v59 = vld [vmem:[%s3949_s7 + $0x78] sm:$0xff] }
 0xe0f   :  { %v1886_v63 = vmax.f32 %v1876_v60, 0.0  ;;  %2245 = vmatprep.subr.bf16.mxu0 %v2779_v18  ;;  %v2783_v8 = vcombine.high %v2031_v58, %v2035_v59  ;;  %v2782_v13 = vcombine.low %v2031_v58, %v2035_v59 }
 0xe10   :  { %v1884_v1 = vmax.f32 %v1868_v61, 0.0 }
 0xe11   :  { %v1890_v4 = vpack.c.bf16 %v1886_v63, %v1885_v62 }
 0xe12   :  { %v1889_v5 = vpack.c.bf16 %v1884_v1, %v1883_v0  ;;  %2246 = vmatpush1.bf16.msra.mxu0 %v2778_v15 }
 0xe13   :  { %2389 = vmatprep.subr.bf16.mxu0 %v2775_v23 }
 0xe14   :  { %3154 = vmatprep.mubr.msk.bf16.mxu0 %vm647_vm1, %v1889_v5  ;;  %v2781_v5 = vcombine.high %v2030_v52, %v2034_v36 }
 0xe15   :  { %3155 = vmatmul.mubr.msk.bf16.gmra.mrb[64].mxu0 %vm647_vm1, %v1890_v4 }
 0xe16   :  { %2275 = vmatprep.mubr.bf16.mxu0 %v3224_v2 }
 0xee0   :  { %v3152_v24 = vpop.f32.mrb[60].mxu0 }
 0xee1   :  { %v1962_v25 = vadd.f32 %v3152_v24, %v1894_v19  ;;  %v1953_v27 = vpop.f32.mrb[61].mxu0 }
 0xee2   :  { %v1954_v28 = vadd.f32 %v1953_v27, %v1894_v19  ;;  %v3153_v29 = vpop.f32.mrb[62].mxu0 }
 0xee3   :  { %v1986_v30 = vmax.f32 %v1962_v25, 0.0  ;;  %v1965_v31 = vadd.f32 %v3153_v29, %v1894_v19  ;;  %v1956_v22 = vpop.f32.mrb[63].mxu0 }
 0xee4   :  { %v1984_v32 = vmax.f32 %v1954_v28, 0.0  ;;  %v1957_v33 = vadd.f32 %v1956_v22, %v1894_v19 }
 0xee5   :  { %v1998_v38 = vmul.f32 %v1995_v26, %v1986_v30  ;;  %v1987_v41 = vmax.f32 %v1965_v31, 0.0 }
 0xee6   :  { %v1996_v43 = vmul.f32 %v1995_v26, %v1984_v32  ;;  %v1985_v44 = vmax.f32 %v1957_v33, 0.0 }
 0xee7   :  { %v1999_v45 = vmul.f32 %v1995_v26, %v1987_v41  ;;  %v2010_v48 = vadd.f32 %v2007_v39, %v1998_v38 }
 0xee8   :  { %v1997_v47 = vmul.f32 %v1995_v26, %v1985_v44  ;;  %v3156_v37 = vpop.f32.mrb[64].mxu0  ;;  %v2008_v53 = vadd.f32 %v2007_v39, %v1996_v43 }
 0xee9   :  { %v2011_v49 = vadd.f32 %v2007_v39, %v1999_v45  ;;  %v1978_v40 = vadd.f32 %v3156_v37, %v1894_v19  ;;  %v1969_v51 = vpop.f32.mrb[65].mxu0 }
 0xeea   :  { %v2009_v54 = vadd.f32 %v2007_v39, %v1997_v47  ;;  %v1970_v55 = vadd.f32 %v1969_v51, %v1894_v19  ;;  %v3157_v57 = vpop.f32.mrb[66].mxu0 }
 0xeeb   :  { %v2017_v46 = vpack.c.bf16 %v2011_v49, %v2010_v48  ;;  %v1990_v60 = vmax.f32 %v1978_v40, 0.0  ;;  %v1981_v50 = vadd.f32 %v3157_v57, %v1894_v19  ;;  %v1972_v61 = vpop.f32.mrb[67].mxu0 }
 0xeec   :  { %v2016_v62 = vpack.c.bf16 %v2009_v54, %v2008_v53  ;;  %v1988_v63 = vmax.f32 %v1970_v55, 0.0  ;;  %v1973_v0 = vadd.f32 %v1972_v61, %v1894_v19 }
 0xeed   :  { %v2002_v1 = vmul.f32 %v1995_v26, %v1990_v60  ;;  %v1991_v4 = vmax.f32 %v1981_v50, 0.0 }
 0xeee   :  { %v2000_v9 = vmul.f32 %v1995_v26, %v1988_v63  ;;  %v1989_v10 = vmax.f32 %v1973_v0, 0.0  ;;  %2784 = vmatmul.mubr.msk.bf16.vlgmr.msra.gmra.mrb[68].mxu1 %vm647_vm1, %v2016_v62  ;;  %2788 = vmatmul.mubr.msk.bf16.vlgmr.msra.gmra.mrb[68].mxu0 %vm647_vm1, %v2016_v62 }
 0xeef   :  { %v2003_v11 = vmul.f32 %v1995_v26, %v1991_v4  ;;  %2317 = vmatpush1.bf16.msra.mxu1 %v2772_v20  ;;  %2390 = vmatpush1.bf16.msra.mxu0 %v2774_v7  ;;  %v2014_v18 = vadd.f32 %v2007_v39, %v2002_v1  ;;  %v3832_v20 = vld [vmem:[%s3950_s8] sm:$0xff]  ;;  %s3227_s8 = smov [#allocation2]  }
 0xef0   :  { %v2001_v15 = vmul.f32 %v1995_v26, %v1989_v10  ;;  %2212 = vmatprep.mubr.bf16.mxu1 %v3224_v2  ;;  %2285 = vmatprep.mubr.bf16.mxu0 %v3224_v2  ;;  %v2012_v3 = vadd.f32 %v2007_v39, %v2000_v9  ;;  %v3836_v7 = vrot.slane %v3832_v20, %v3442_v6  ;;  %s2595_s18 = sshll.u32 %s3227_s8, 4  ;;  %s2596_s18 = int_to_ptr.vmem [resolvable:$true] %s2595_s18 }
 0xef1   :  { %v2015_v42 = vadd.f32 %v2007_v39, %v2003_v11  ;;  %2318 = vmatprep.subr.bf16.mxu1 %v2781_v5  ;;  %2391 = vmatprep.subr.bf16.mxu0 %v2783_v8  ;;  %v3840_v23 = vrot.slane %v3832_v20, %v3604_v14  ;;  %v3848_v19 = vrot.slane %v3832_v20, %v3608_v16  ;;  %s3200_s5 = scalar_lea.vmem %s2596_s18, 8192  ;;  %p3205_p1 = scmp.lt.s32.totalorder %s2596_s18, %s2596_s18 }
 0xef2   :  { %v2013_v17 = vadd.f32 %v2007_v39, %v2001_v15  ;;  %p3201_p0 = scmp.ne.s32.totalorder %s2596_s18, %s3200_s5  ;;  %p3206_p2 = scmp.lt.s32.totalorder %s3200_s5, %s3200_s5 }
 0xef3   :  { %v2019_v21 = vpack.c.bf16 %v2015_v42, %v2014_v18  ;;  %2319 = vmatpush1.bf16.msra.mxu1 %v2780_v12  ;;  %2392 = vmatpush1.bf16.msra.mxu0 %v2782_v13 }
 0xef4   :  { %v2018_v56 = vpack.c.bf16 %v2013_v17, %v2012_v3  ;;  %p3207_p3 = por %p3206_p2, %p3205_p1 }
 0xef6   :  { %2785 = vmatmul.mubr.msk.bf16.gmra.mrb[72].mxu1 %vm647_vm1, %v2017_v46  ;;  %2789 = vmatmul.mubr.msk.bf16.gmra.mrb[72].mxu0 %vm647_vm1, %v2017_v46  ;;  %p3208_p4 = pnand %p3207_p3, %p3201_p0 }
 0xef7   :  { %2222 = vmatprep.mubr.bf16.mxu1 %v3224_v2  ;;  %2295 = vmatprep.mubr.bf16.mxu0 %v3224_v2 }
 0xefe   :  { %2786 = vmatmul.mubr.msk.bf16.gmra.mrb[76].mxu1 %vm647_vm1, %v2018_v56  ;;  %2790 = vmatmul.mubr.msk.bf16.gmra.mrb[76].mxu0 %vm647_vm1, %v2018_v56 }
 0xeff   :  { %2232 = vmatprep.mubr.bf16.mxu1 %v3224_v2  ;;  %2305 = vmatprep.mubr.bf16.mxu0 %v3224_v2 }
 0xf06   :  { %2787 = vmatmul.mubr.msk.bf16.gmra.mrb[80].mxu1 %vm647_vm1, %v2019_v21  ;;  %2791 = vmatmul.mubr.msk.bf16.gmra.mrb[80].mxu0 %vm647_vm1, %v2019_v21 }
 0xf07   :  { %2348 = vmatprep.mubr.bf16.mxu1 %v3224_v2  ;;  %2421 = vmatprep.mubr.bf16.mxu0 %v3224_v2 }
 0xf0e   :  { %2792 = vmatmul.mubr.msk.bf16.vlgmr.msra.gmra.mrb[84].mxu1 %vm647_vm1, %v2016_v62  ;;  %2796 = vmatmul.mubr.msk.bf16.vlgmr.msra.gmra.mrb[84].mxu0 %vm647_vm1, %v2016_v62 }
 0xf0f   :  { %2358 = vmatprep.mubr.bf16.mxu1 %v3224_v2  ;;  %2431 = vmatprep.mubr.bf16.mxu0 %v3224_v2 }
 0xf16   :  { %2793 = vmatmul.mubr.msk.bf16.gmra.mrb[88].mxu1 %vm647_vm1, %v2017_v46  ;;  %2797 = vmatmul.mubr.msk.bf16.gmra.mrb[88].mxu0 %vm647_vm1, %v2017_v46 }
 0xf17   :  { %2368 = vmatprep.mubr.bf16.mxu1 %v3224_v2  ;;  %2441 = vmatprep.mubr.bf16.mxu0 %v3224_v2 }
 0xf1e   :  { %2794 = vmatmul.mubr.msk.bf16.gmra.mrb[92].mxu1 %vm647_vm1, %v2018_v56  ;;  %2798 = vmatmul.mubr.msk.bf16.gmra.mrb[92].mxu0 %vm647_vm1, %v2018_v56 }
 0xf1f   :  { %2378 = vmatprep.mubr.bf16.mxu1 %v3224_v2  ;;  %2451 = vmatprep.mubr.bf16.mxu0 %v3224_v2  ;;  %v3844_v2 = vrot.slane %v3832_v20, %v3381_v35 }
 0xf26   :  { %2795 = vmatmul.mubr.msk.bf16.gmra.mrb[96].mxu1 %vm647_vm1, %v2019_v21  ;;  %2799 = vmatmul.mubr.msk.bf16.gmra.mrb[96].mxu0 %vm647_vm1, %v2019_v21 }
 0xfc1   :  { %v2204_v24 = vpop.f32.mrb[68].mxu1  ;;  %v2277_v25 = vpop.f32.mrb[68].mxu0 }
 0xfc2   :  { %v2205_v26 = vadd.f32 %v2204_v24, %v3836_v7  ;;  %v2278_v27 = vadd.f32 %v2277_v25, %v3840_v23  ;;  %v2206_v6 = vpop.f32.mrb[69].mxu1  ;;  %v2279_v28 = vpop.f32.mrb[69].mxu0 }
 0xfc3   :  { %v2207_v29 = vadd.f32 %v2206_v6, %v3844_v2  ;;  %v2280_v14 = vadd.f32 %v2279_v28, %v3848_v19  ;;  %v2208_v30 = vpop.f32.mrb[70].mxu1  ;;  %v2281_v31 = vpop.f32.mrb[70].mxu0 }
 0xfc4   :  { %v2462_v35 = vmax.f32 %v2205_v26, 0.0  ;;  %v2464_v22 = vmax.f32 %v2278_v27, 0.0  ;;  %v2209_v32 = vadd.f32 %v2208_v30, %v3836_v7  ;;  %v2282_v16 = vadd.f32 %v2281_v31, %v3840_v23  ;;  %v2210_v33 = vpop.f32.mrb[71].mxu1  ;;  %v2283_v38 = vpop.f32.mrb[71].mxu0 }
 0xfc5   :  { %v2463_v39 = vmax.f32 %v2207_v29, 0.0  ;;  %v2465_v41 = vmax.f32 %v2280_v14, 0.0  ;;  %v2211_v43 = vadd.f32 %v2210_v33, %v3844_v2  ;;  %v2284_v44 = vadd.f32 %v2283_v38, %v3848_v19 }
 0xfc6   :  { %2526 = vst [vmem:[#allocation2] sm:$0xff] %v2462_v35  ;;  %2528 = vst [vmem:[#allocation2 + $0x10] sm:$0xff] %v2464_v22  ;;  %v2470_v45 = vmax.f32 %v2209_v32, 0.0  ;;  %v2472_v47 = vmax.f32 %v2282_v16, 0.0 }
 0xfc7   :  { %2527 = vst [vmem:[#allocation2 + $0x8] sm:$0xff] %v2463_v39  ;;  %2529 = vst [vmem:[#allocation2 + $0x18] sm:$0xff] %v2465_v41  ;;  %v2471_v37 = vmax.f32 %v2211_v43, 0.0  ;;  %v2473_v48 = vmax.f32 %v2284_v44, 0.0 }
 0xfc8   :  { %2534 = vst [vmem:[#allocation2 + $0x40] sm:$0xff] %v2470_v45  ;;  %2536 = vst [vmem:[#allocation2 + $0x50] sm:$0xff] %v2472_v47  ;;  %v2056_v45 = vsub.s32 4, %v3378_v34  ;;  %v2064_v47 = vsub.s32 6, %v3378_v34 }
 0xfc9   :  { %2535 = vst [vmem:[#allocation2 + $0x48] sm:$0xff] %v2471_v37  ;;  %2537 = vst [vmem:[#allocation2 + $0x58] sm:$0xff] %v2473_v48  ;;  %v2214_v49 = vpop.f32.mrb[72].mxu1  ;;  %v2287_v40 = vpop.f32.mrb[72].mxu0 }
 0xfca   :  { %v2215_v51 = vadd.f32 %v2214_v49, %v3836_v7  ;;  %v2288_v52 = vadd.f32 %v2287_v40, %v3840_v23  ;;  %v2216_v53 = vpop.f32.mrb[73].mxu1  ;;  %v2289_v54 = vpop.f32.mrb[73].mxu0 }
 0xfcb   :  { %v2217_v55 = vadd.f32 %v2216_v53, %v3844_v2  ;;  %v2290_v57 = vadd.f32 %v2289_v54, %v3848_v19  ;;  %v2218_v36 = vpop.f32.mrb[74].mxu1  ;;  %v2291_v58 = vpop.f32.mrb[74].mxu0 }
 0xfcc   :  { %v2478_v59 = vmax.f32 %v2215_v51, 0.0  ;;  %v2480_v46 = vmax.f32 %v2288_v52, 0.0  ;;  %v2219_v60 = vadd.f32 %v2218_v36, %v3836_v7  ;;  %v2292_v50 = vadd.f32 %v2291_v58, %v3840_v23  ;;  %v2220_v61 = vpop.f32.mrb[75].mxu1  ;;  %v2293_v62 = vpop.f32.mrb[75].mxu0 }
 0xfcd   :  { %v2479_v63 = vmax.f32 %v2217_v55, 0.0  ;;  %v2481_v0 = vmax.f32 %v2290_v57, 0.0  ;;  %v2221_v1 = vadd.f32 %v2220_v61, %v3844_v2  ;;  %v2294_v4 = vadd.f32 %v2293_v62, %v3848_v19 }
 0xfce   :  { %2542 = vst [vmem:[#allocation2 + $0x80] sm:$0xff] %v2478_v59  ;;  %2544 = vst [vmem:[#allocation2 + $0x90] sm:$0xff] %v2480_v46  ;;  %v2486_v5 = vmax.f32 %v2219_v60, 0.0  ;;  %v2488_v8 = vmax.f32 %v2292_v50, 0.0  ;;  %v2060_v51 = vsub.s32 5, %v3378_v34  ;;  %v2068_v52 = vsub.s32 7, %v3378_v34 }
 0xfcf   :  { %2543 = vst [vmem:[#allocation2 + $0x88] sm:$0xff] %v2479_v63  ;;  %2545 = vst [vmem:[#allocation2 + $0x98] sm:$0xff] %v2481_v0  ;;  %v2487_v9 = vmax.f32 %v2221_v1, 0.0  ;;  %v2489_v10 = vmax.f32 %v2294_v4, 0.0  ;;  %v3887_v34 = vrot.slane %v3832_v20, %v2056_v45  ;;  %v3890_v63 = vrot.slane %v3832_v20, %v2064_v47 }
 0xfd0   :  { %2550 = vst [vmem:[#allocation2 + $0xc0] sm:$0xff] %v2486_v5  ;;  %2552 = vst [vmem:[#allocation2 + $0xd0] sm:$0xff] %v2488_v8  ;;  %v3893_v0 = vrot.slane %v3832_v20, %v2060_v51 }
 0xfd1   :  { %2551 = vst [vmem:[#allocation2 + $0xc8] sm:$0xff] %v2487_v9  ;;  %2553 = vst [vmem:[#allocation2 + $0xd8] sm:$0xff] %v2489_v10  ;;  %v2224_v11 = vpop.f32.mrb[76].mxu1  ;;  %v2297_v12 = vpop.f32.mrb[76].mxu0 }
 0xfd2   :  { %v2225_v13 = vadd.f32 %v2224_v11, %v3836_v7  ;;  %v2298_v15 = vadd.f32 %v2297_v12, %v3840_v23  ;;  %v2226_v18 = vpop.f32.mrb[77].mxu1  ;;  %v2299_v42 = vpop.f32.mrb[77].mxu0 }
 0xfd3   :  { %v2227_v3 = vadd.f32 %v2226_v18, %v3844_v2  ;;  %v2300_v17 = vadd.f32 %v2299_v42, %v3848_v19  ;;  %v2228_v21 = vpop.f32.mrb[78].mxu1  ;;  %v2301_v56 = vpop.f32.mrb[78].mxu0 }
 0xfd4   :  { %v2494_v24 = vmax.f32 %v2225_v13, 0.0  ;;  %v2496_v25 = vmax.f32 %v2298_v15, 0.0  ;;  %v2229_v26 = vadd.f32 %v2228_v21, %v3836_v7  ;;  %v2302_v27 = vadd.f32 %v2301_v56, %v3840_v23  ;;  %v2230_v6 = vpop.f32.mrb[79].mxu1  ;;  %v2303_v28 = vpop.f32.mrb[79].mxu0 }
 0xfd5   :  { %v2495_v29 = vmax.f32 %v2227_v3, 0.0  ;;  %v2497_v14 = vmax.f32 %v2300_v17, 0.0  ;;  %v2231_v30 = vadd.f32 %v2230_v6, %v3844_v2  ;;  %v2304_v31 = vadd.f32 %v2303_v28, %v3848_v19 }
 0xfd6   :  { %2558 = vst [vmem:[#allocation2 + $0x100] sm:$0xff] %v2494_v24  ;;  %2560 = vst [vmem:[#allocation2 + $0x110] sm:$0xff] %v2496_v25  ;;  %v2502_v35 = vmax.f32 %v2229_v26, 0.0  ;;  %v2504_v22 = vmax.f32 %v2302_v27, 0.0 }
 0xfd7   :  { %2559 = vst [vmem:[#allocation2 + $0x108] sm:$0xff] %v2495_v29  ;;  %2561 = vst [vmem:[#allocation2 + $0x118] sm:$0xff] %v2497_v14  ;;  %v2503_v32 = vmax.f32 %v2231_v30, 0.0  ;;  %v2505_v16 = vmax.f32 %v2304_v31, 0.0 }
 0xfd8   :  { %2566 = vst [vmem:[#allocation2 + $0x140] sm:$0xff] %v2502_v35  ;;  %2568 = vst [vmem:[#allocation2 + $0x150] sm:$0xff] %v2504_v22 }
 0xfd9   :  { %2567 = vst [vmem:[#allocation2 + $0x148] sm:$0xff] %v2503_v32  ;;  %2569 = vst [vmem:[#allocation2 + $0x158] sm:$0xff] %v2505_v16  ;;  %v2234_v33 = vpop.f32.mrb[80].mxu1  ;;  %v2307_v38 = vpop.f32.mrb[80].mxu0 }
 0xfda   :  { %v2235_v39 = vadd.f32 %v2234_v33, %v3836_v7  ;;  %v2308_v41 = vadd.f32 %v2307_v38, %v3840_v23  ;;  %v2236_v43 = vpop.f32.mrb[81].mxu1  ;;  %v2309_v44 = vpop.f32.mrb[81].mxu0 }
 0xfdb   :  { %v2237_v37 = vadd.f32 %v2236_v43, %v3844_v2  ;;  %v2310_v48 = vadd.f32 %v2309_v44, %v3848_v19  ;;  %v2238_v49 = vpop.f32.mrb[82].mxu1  ;;  %v2311_v40 = vpop.f32.mrb[82].mxu0 }
 0xfdc   :  { %v2510_v53 = vmax.f32 %v2235_v39, 0.0  ;;  %v2512_v54 = vmax.f32 %v2308_v41, 0.0  ;;  %v2239_v55 = vadd.f32 %v2238_v49, %v3836_v7  ;;  %v2312_v57 = vadd.f32 %v2311_v40, %v3840_v23  ;;  %v2240_v36 = vpop.f32.mrb[83].mxu1  ;;  %v2313_v58 = vpop.f32.mrb[83].mxu0 }
 0xfdd   :  { %v2511_v59 = vmax.f32 %v2237_v37, 0.0  ;;  %v2513_v46 = vmax.f32 %v2310_v48, 0.0  ;;  %v2241_v60 = vadd.f32 %v2240_v36, %v3844_v2  ;;  %v2314_v50 = vadd.f32 %v2313_v58, %v3848_v19 }
 0xfde   :  { %2574 = vst [vmem:[#allocation2 + $0x180] sm:$0xff] %v2510_v53  ;;  %2576 = vst [vmem:[#allocation2 + $0x190] sm:$0xff] %v2512_v54  ;;  %v2518_v61 = vmax.f32 %v2239_v55, 0.0  ;;  %v2520_v62 = vmax.f32 %v2312_v57, 0.0  ;;  %v3896_v2 = vrot.slane %v3832_v20, %v2068_v52 }
 0xfdf   :  { %2575 = vst [vmem:[#allocation2 + $0x188] sm:$0xff] %v2511_v59  ;;  %2577 = vst [vmem:[#allocation2 + $0x198] sm:$0xff] %v2513_v46  ;;  %v2519_v7 = vmax.f32 %v2241_v60, 0.0  ;;  %v2521_v23 = vmax.f32 %v2314_v50, 0.0 }
 0xfe0   :  { %2582 = vst [vmem:[#allocation2 + $0x1c0] sm:$0xff] %v2518_v61  ;;  %2584 = vst [vmem:[#allocation2 + $0x1d0] sm:$0xff] %v2520_v62 }
 0xfe1   :  { %2583 = vst [vmem:[#allocation2 + $0x1c8] sm:$0xff] %v2519_v7  ;;  %2585 = vst [vmem:[#allocation2 + $0x1d8] sm:$0xff] %v2521_v23  ;;  %v2350_v19 = vpop.f32.mrb[84].mxu1  ;;  %v2423_v1 = vpop.f32.mrb[84].mxu0 }
 0xfe2   :  { %v2351_v4 = vadd.f32 %v2350_v19, %v3887_v34  ;;  %v2424_v5 = vadd.f32 %v2423_v1, %v3890_v63  ;;  %v2352_v8 = vpop.f32.mrb[85].mxu1  ;;  %v2425_v9 = vpop.f32.mrb[85].mxu0 }
 0xfe3   :  { %v2353_v10 = vadd.f32 %v2352_v8, %v3893_v0  ;;  %v2426_v11 = vadd.f32 %v2425_v9, %v3896_v2  ;;  %v2354_v12 = vpop.f32.mrb[86].mxu1  ;;  %v2427_v13 = vpop.f32.mrb[86].mxu0 }
 0xfe4   :  { %v2466_v20 = vmax.f32 %v2351_v4, 0.0  ;;  %v2468_v15 = vmax.f32 %v2424_v5, 0.0  ;;  %v2355_v18 = vadd.f32 %v2354_v12, %v3887_v34  ;;  %v2428_v42 = vadd.f32 %v2427_v13, %v3890_v63  ;;  %v2356_v3 = vpop.f32.mrb[87].mxu1  ;;  %v2429_v17 = vpop.f32.mrb[87].mxu0 }
 0xfe5   :  { %v2467_v21 = vmax.f32 %v2353_v10, 0.0  ;;  %v2469_v56 = vmax.f32 %v2426_v11, 0.0  ;;  %v2357_v24 = vadd.f32 %v2356_v3, %v3893_v0  ;;  %v2430_v25 = vadd.f32 %v2429_v17, %v3896_v2 }
 0xfe6   :  { %2530 = vst [vmem:[#allocation2 + $0x20] sm:$0xff] %v2466_v20  ;;  %2532 = vst [vmem:[#allocation2 + $0x30] sm:$0xff] %v2468_v15  ;;  %v2474_v26 = vmax.f32 %v2355_v18, 0.0  ;;  %v2476_v27 = vmax.f32 %v2428_v42, 0.0 }
 0xfe7   :  { %2531 = vst [vmem:[#allocation2 + $0x28] sm:$0xff] %v2467_v21  ;;  %2533 = vst [vmem:[#allocation2 + $0x38] sm:$0xff] %v2469_v56  ;;  %v2475_v6 = vmax.f32 %v2357_v24, 0.0  ;;  %v2477_v28 = vmax.f32 %v2430_v25, 0.0 }
 0xfe8   :  { %2538 = vst [vmem:[#allocation2 + $0x60] sm:$0xff] %v2474_v26  ;;  %2540 = vst [vmem:[#allocation2 + $0x70] sm:$0xff] %v2476_v27 }
 0xfe9   :  { %2539 = vst [vmem:[#allocation2 + $0x68] sm:$0xff] %v2475_v6  ;;  %2541 = vst [vmem:[#allocation2 + $0x78] sm:$0xff] %v2477_v28  ;;  %v2360_v29 = vpop.f32.mrb[88].mxu1  ;;  %v2433_v14 = vpop.f32.mrb[88].mxu0 }
 0xfea   :  { %v2361_v30 = vadd.f32 %v2360_v29, %v3887_v34  ;;  %v2434_v31 = vadd.f32 %v2433_v14, %v3890_v63  ;;  %v2362_v35 = vpop.f32.mrb[89].mxu1  ;;  %v2435_v22 = vpop.f32.mrb[89].mxu0 }
 0xfeb   :  { %v2363_v32 = vadd.f32 %v2362_v35, %v3893_v0  ;;  %v2436_v16 = vadd.f32 %v2435_v22, %v3896_v2  ;;  %v2364_v33 = vpop.f32.mrb[90].mxu1  ;;  %v2437_v38 = vpop.f32.mrb[90].mxu0 }
 0xfec   :  { %v2482_v39 = vmax.f32 %v2361_v30, 0.0  ;;  %v2484_v41 = vmax.f32 %v2434_v31, 0.0  ;;  %v2365_v43 = vadd.f32 %v2364_v33, %v3887_v34  ;;  %v2438_v44 = vadd.f32 %v2437_v38, %v3890_v63  ;;  %v2366_v45 = vpop.f32.mrb[91].mxu1  ;;  %v2439_v47 = vpop.f32.mrb[91].mxu0 }
 0xfed   :  { %v2483_v37 = vmax.f32 %v2363_v32, 0.0  ;;  %v2485_v48 = vmax.f32 %v2436_v16, 0.0  ;;  %v2367_v49 = vadd.f32 %v2366_v45, %v3893_v0  ;;  %v2440_v40 = vadd.f32 %v2439_v47, %v3896_v2 }
 0xfee   :  { %2546 = vst [vmem:[#allocation2 + $0xa0] sm:$0xff] %v2482_v39  ;;  %2548 = vst [vmem:[#allocation2 + $0xb0] sm:$0xff] %v2484_v41  ;;  %v2490_v51 = vmax.f32 %v2365_v43, 0.0  ;;  %v2492_v52 = vmax.f32 %v2438_v44, 0.0 }
 0xfef   :  { %2547 = vst [vmem:[#allocation2 + $0xa8] sm:$0xff] %v2483_v37  ;;  %2549 = vst [vmem:[#allocation2 + $0xb8] sm:$0xff] %v2485_v48  ;;  %v2491_v53 = vmax.f32 %v2367_v49, 0.0  ;;  %v2493_v54 = vmax.f32 %v2440_v40, 0.0 }
 0xff0   :  { %2554 = vst [vmem:[#allocation2 + $0xe0] sm:$0xff] %v2490_v51  ;;  %2556 = vst [vmem:[#allocation2 + $0xf0] sm:$0xff] %v2492_v52 }
 0xff1   :  { %2555 = vst [vmem:[#allocation2 + $0xe8] sm:$0xff] %v2491_v53  ;;  %2557 = vst [vmem:[#allocation2 + $0xf8] sm:$0xff] %v2493_v54  ;;  %v2370_v55 = vpop.f32.mrb[92].mxu1  ;;  %v2443_v57 = vpop.f32.mrb[92].mxu0 }
 0xff2   :  { %v2371_v36 = vadd.f32 %v2370_v55, %v3887_v34  ;;  %v2444_v58 = vadd.f32 %v2443_v57, %v3890_v63  ;;  %v2372_v59 = vpop.f32.mrb[93].mxu1  ;;  %v2445_v46 = vpop.f32.mrb[93].mxu0 }
 0xff3   :  { %v2373_v60 = vadd.f32 %v2372_v59, %v3893_v0  ;;  %v2446_v50 = vadd.f32 %v2445_v46, %v3896_v2  ;;  %v2374_v61 = vpop.f32.mrb[94].mxu1  ;;  %v2447_v62 = vpop.f32.mrb[94].mxu0 }
 0xff4   :  { %v2498_v7 = vmax.f32 %v2371_v36, 0.0  ;;  %v2500_v23 = vmax.f32 %v2444_v58, 0.0  ;;  %v2375_v19 = vadd.f32 %v2374_v61, %v3887_v34  ;;  %v2448_v1 = vadd.f32 %v2447_v62, %v3890_v63  ;;  %v2376_v4 = vpop.f32.mrb[95].mxu1  ;;  %v2449_v5 = vpop.f32.mrb[95].mxu0 }
 0xff5   :  { %v2499_v8 = vmax.f32 %v2373_v60, 0.0  ;;  %v2501_v9 = vmax.f32 %v2446_v50, 0.0  ;;  %v2377_v10 = vadd.f32 %v2376_v4, %v3893_v0  ;;  %v2450_v11 = vadd.f32 %v2449_v5, %v3896_v2 }
 0xff6   :  { %2562 = vst [vmem:[#allocation2 + $0x120] sm:$0xff] %v2498_v7  ;;  %2564 = vst [vmem:[#allocation2 + $0x130] sm:$0xff] %v2500_v23  ;;  %v2506_v12 = vmax.f32 %v2375_v19, 0.0  ;;  %v2508_v13 = vmax.f32 %v2448_v1, 0.0 }
 0xff7   :  { %2563 = vst [vmem:[#allocation2 + $0x128] sm:$0xff] %v2499_v8  ;;  %2565 = vst [vmem:[#allocation2 + $0x138] sm:$0xff] %v2501_v9  ;;  %v2507_v20 = vmax.f32 %v2377_v10, 0.0  ;;  %v2509_v15 = vmax.f32 %v2450_v11, 0.0 }
 0xff8   :  { %2570 = vst [vmem:[#allocation2 + $0x160] sm:$0xff] %v2506_v12  ;;  %2572 = vst [vmem:[#allocation2 + $0x170] sm:$0xff] %v2508_v13 }
 0xff9   :  { %2571 = vst [vmem:[#allocation2 + $0x168] sm:$0xff] %v2507_v20  ;;  %2573 = vst [vmem:[#allocation2 + $0x178] sm:$0xff] %v2509_v15  ;;  %v2380_v18 = vpop.f32.mrb[96].mxu1  ;;  %v2453_v42 = vpop.f32.mrb[96].mxu0 }
 0xffa   :  { %v2381_v3 = vadd.f32 %v2380_v18, %v3887_v34  ;;  %v2454_v17 = vadd.f32 %v2453_v42, %v3890_v63  ;;  %v2382_v21 = vpop.f32.mrb[97].mxu1  ;;  %v2455_v56 = vpop.f32.mrb[97].mxu0 }
 0xffb   :  { %v2383_v24 = vadd.f32 %v2382_v21, %v3893_v0  ;;  %v2456_v25 = vadd.f32 %v2455_v56, %v3896_v2  ;;  %v2384_v26 = vpop.f32.mrb[98].mxu1  ;;  %v2457_v27 = vpop.f32.mrb[98].mxu0 }
 0xffc   :  { %v2514_v6 = vmax.f32 %v2381_v3, 0.0  ;;  %v2516_v28 = vmax.f32 %v2454_v17, 0.0  ;;  %v2385_v29 = vadd.f32 %v2384_v26, %v3887_v34  ;;  %v2458_v14 = vadd.f32 %v2457_v27, %v3890_v63  ;;  %v2386_v30 = vpop.f32.mrb[99].mxu1  ;;  %v2459_v31 = vpop.f32.mrb[99].mxu0 }
 0xffd   :  { %v2515_v35 = vmax.f32 %v2383_v24, 0.0  ;;  %v2517_v22 = vmax.f32 %v2456_v25, 0.0  ;;  %v2387_v32 = vadd.f32 %v2386_v30, %v3893_v0  ;;  %v2460_v16 = vadd.f32 %v2459_v31, %v3896_v2 }
 0xffe   :  { %2578 = vst [vmem:[#allocation2 + $0x1a0] sm:$0xff] %v2514_v6  ;;  %2580 = vst [vmem:[#allocation2 + $0x1b0] sm:$0xff] %v2516_v28  ;;  %v2522_v33 = vmax.f32 %v2385_v29, 0.0  ;;  %v2524_v38 = vmax.f32 %v2458_v14, 0.0 }
 0xfff   :  { %2579 = vst [vmem:[#allocation2 + $0x1a8] sm:$0xff] %v2515_v35  ;;  %2581 = vst [vmem:[#allocation2 + $0x1b8] sm:$0xff] %v2517_v22  ;;  %v2523_v39 = vmax.f32 %v2387_v32, 0.0  ;;  %v2525_v34 = vmax.f32 %v2460_v16, 0.0 }
0x1000   :  { %2586 = vst [vmem:[#allocation2 + $0x1e0] sm:$0xff] %v2522_v33  ;;  %2588 = vst [vmem:[#allocation2 + $0x1f0] sm:$0xff] %v2524_v38 }
0x1001   :  { %2587 = vst [vmem:[#allocation2 + $0x1e8] sm:$0xff] %v2523_v39  ;;  %2589 = vst [vmem:[#allocation2 + $0x1f8] sm:$0xff] %v2525_v34 }
0x1002   :  { %3211 = shalt.err (!%p3208_p4)
}
0x1003   :  { %s3212_s3 = scalar_lea.hbm %s3951_s9, 8192 }
0x1004   :  { %p3213_p5 = scmp.ne.s32.totalorder %s3951_s9, %s3212_s3  ;;  %p3216_p6 = scmp.lt.u32.totalorder %s3212_s3, %s3951_s9 }
0x1006   :  { %p3218_p7 = pnand %p3216_p6, %p3213_p5 }
0x1008   :  { %3221 = shalt.err (!%p3218_p7)
}
0x1009   :  { %s3228_s24 = smov 1024   ;;  %s3229_s25 = smov 64  }
0x100a   :  { %2601 = dma.vmem_to_hbm [thread:$0]  %s2596_s18, 8192, %s3951_s9, [#allocation3], %s3228_s24, %s3228_s24, %s3229_s25  }
0x100b   :  { %3222 = dma.done.wait [#allocation3], 8192  }
0x100c   :  { %3223 = vsyncadd [#allocation3], 4294959104 }
0x100d   :  { %2605 = vsyncpa [#allocation3], 1 }

</bundles_post_ra>
